<compile_context>
chip_gen: v7x
topology: tpu7x:2x2x1
jax: 0.10.0
libtpu: 0.0.40
codegen_flags: <defaults>
</compile_context>

<pallas_src>
import functools
import math

import jax
import jax.numpy as jnp
from jax.experimental import pallas as pl
from jax.experimental.pallas import tpu as pltpu


def _default_vmem_limit():
    # v5e/v6e: 128 MiB physical VMEM -> ~96 MiB budget; v7x: 64 MiB -> ~48 MiB budget.
    try:
        cap = int(pltpu.get_tpu_info().vmem_capacity_bytes)
    except Exception:
        cap = 64 * 1024 * 1024
    return max(32 * 1024 * 1024, min(cap * 3 // 4, 112 * 1024 * 1024))


_VMEM_LIMIT = _default_vmem_limit()


def _row_tile(r, cap=512):
    """Row tile for matmul-style kernels; boundary blocks are masked via a cdiv grid."""
    return r if r <= cap else cap


def _strip_rows(ho, wo, c, budget=512 * 1024):
    """Largest divisor of ho (<=16, roughly vreg-budget-bounded) for strip accumulation."""
    cap = max(1, min(16, budget // max(1, wo * c * 4)))
    cap = min(cap, ho)
    for s in range(cap, 0, -1):
        if ho % s == 0:
            return s
    return 1


# ---------------------------------------------------------------------------
# Pallas kernels
# ---------------------------------------------------------------------------

def _mm_affine_silu_kernel(x_ref, w_ref, s_ref, b_ref, o_ref):
    """(tm, K) @ (K, C) bf16 matmul (fp32 acc), folded-BN affine, SiLU."""
    y = jnp.dot(x_ref[...], w_ref[...], preferred_element_type=jnp.float32)
    y = y * s_ref[...] + b_ref[...]
    o_ref[...] = (y * jax.nn.sigmoid(y)).astype(o_ref.dtype)


def _dw_s1_kernel(x_ref, w_ref, s_ref, b_ref, o_ref, pool_ref, xp_ref, *, k, strip):
    """Stride-1 depthwise conv on one image plane.

    The zero-padded plane is built in a VMEM scratch (no HBM pad pass).  Output rows are
    processed in strips: all K*K taps of a strip are accumulated in fp32 and stored once,
    folded BN + SiLU fused, and the SE global-average-pool emitted as a (1, C) output.
    """
    h, wdim, c = x_ref.shape
    pad = (k - 1) // 2
    hp, wp = h + 2 * pad, wdim + 2 * pad

    # Build the padded plane in VMEM: interior copy + zero borders (disjoint regions).
    xp_ref[pl.ds(pad, h), pl.ds(pad, wdim), :] = x_ref[...]
    if pad:
        zrow = jnp.zeros((pad, wp, c), x_ref.dtype)
        xp_ref[pl.ds(0, pad), :, :] = zrow
        xp_ref[pl.ds(hp - pad, pad), :, :] = zrow
        zcol = jnp.zeros((hp, pad, c), x_ref.dtype)
        xp_ref[:, pl.ds(0, pad), :] = zcol
        xp_ref[:, pl.ds(wp - pad, pad), :] = zcol

    w_all = w_ref[...]
    s_all = s_ref[...]
    b_all = b_ref[...]
    pool_ref[...] = jnp.zeros_like(pool_ref)
    n_strips = h // strip

    def body(si, carry):
        r0 = si * strip
        acc = jnp.zeros((strip, wdim, c), jnp.float32)
        for di in range(k):
            for dj in range(k):
                # TODO(synk): the dj (sublane) shifts could be generated with pltpu.roll on
                # an already-loaded strip to move the shuffle work onto the idle XLU slot.
                tap = xp_ref[pl.ds(r0 + di, strip), pl.ds(dj, wdim), :]
                acc = acc + tap.astype(jnp.float32) * w_all[di * k + dj]
        y = acc * s_all + b_all
        y = y * jax.nn.sigmoid(y)
        o_ref[pl.ds(r0, strip), :, :] = y.astype(o_ref.dtype)
        pool_ref[...] = pool_ref[...] + jnp.sum(jnp.sum(y, axis=0), axis=0, keepdims=True)
        return carry

    jax.lax.fori_loop(0, n_strips, body, 0)
    pool_ref[...] = pool_ref[...] * (1.0 / (h * wdim))


def _dw_s2_kernel(ph_ref, w_ref, s_ref, b_ref, o_ref, pool_ref, *, k, ho, wo, strip):
    """Stride-2 depthwise conv from 4 stride-2 phase planes (no im2col blow-up in HBM).

    Tap (di, dj) reads phase plane (di%2, dj%2) at unit-stride offsets (di//2, dj//2).
    Strip-accumulated, folded BN + SiLU, fused SE global-average-pool output.
    """
    c = o_ref.shape[-1]
    w_all = w_ref[...]
    s_all = s_ref[...]
    b_all = b_ref[...]
    pool_ref[...] = jnp.zeros_like(pool_ref)
    n_strips = ho // strip

    def body(si, carry):
        r0 = si * strip
        acc = jnp.zeros((strip, wo, c), jnp.float32)
        for di in range(k):
            for dj in range(k):
                ph = (di % 2) * 2 + (dj % 2)
                tap = ph_ref[ph, pl.ds(r0 + di // 2, strip), pl.ds(dj // 2, wo), :]
                acc = acc + tap.astype(jnp.float32) * w_all[di * k + dj]
        y = acc * s_all + b_all
        y = y * jax.nn.sigmoid(y)
        o_ref[pl.ds(r0, strip), :, :] = y.astype(o_ref.dtype)
        pool_ref[...] = pool_ref[...] + jnp.sum(jnp.sum(y, axis=0), axis=0, keepdims=True)
        return carry

    jax.lax.fori_loop(0, n_strips, body, 0)
    pool_ref[...] = pool_ref[...] * (1.0 / (ho * wo))


def _se_fc_kernel(p_ref, w1_ref, b1_ref, w2_ref, b2_ref, o_ref):
    """SE gate from a pre-pooled (N, C) vector: fc1 -> SiLU -> fc2 -> sigmoid."""
    h = jnp.dot(p_ref[...], w1_ref[...], preferred_element_type=jnp.float32) + b1_ref[...]
    h = h * jax.nn.sigmoid(h)
    g = jnp.dot(h, w2_ref[...], preferred_element_type=jnp.float32) + b2_ref[...]
    o_ref[...] = jax.nn.sigmoid(g).astype(o_ref.dtype)


def _proj_kernel(x_ref, g_ref, w_ref, s_ref, b_ref, o_ref):
    """SE-scale (per-image (1,C) gate), 1x1 project conv, folded BN (no activation)."""
    xg = x_ref[...] * g_ref[...]
    y = jnp.dot(xg, w_ref[...], preferred_element_type=jnp.float32)
    o_ref[...] = (y * s_ref[...] + b_ref[...]).astype(o_ref.dtype)


def _proj_res_kernel(x_ref, g_ref, w_ref, s_ref, b_ref, r_ref, o_ref):
    """Same as _proj_kernel with fused residual add."""
    xg = x_ref[...] * g_ref[...]
    y = jnp.dot(xg, w_ref[...], preferred_element_type=jnp.float32)
    y = y * s_ref[...] + b_ref[...] + r_ref[...].astype(jnp.float32)
    o_ref[...] = y.astype(o_ref.dtype)


def _pool_fc_kernel(x_ref, w_ref, b_ref, o_ref):
    """Per-image global average pool over spatial rows + Linear classifier (lane-padded)."""
    pooled = jnp.mean(x_ref[...].astype(jnp.float32), axis=0, keepdims=True)   # (1, C)
    o_ref[...] = jnp.dot(pooled, w_ref[...], preferred_element_type=jnp.float32) + b_ref[...]


# ---------------------------------------------------------------------------
# pallas_call wrappers (jit gives per-shape caching)
# ---------------------------------------------------------------------------

def _mm_affine_silu(x, w, s, b):
    r, kdim = x.shape
    c = w.shape[1]
    tm = _row_tile(r)
    return pl.pallas_call(
        _mm_affine_silu_kernel,
        grid=(pl.cdiv(r, tm),),
        in_specs=[pl.BlockSpec((tm, kdim), lambda i: (i, 0)),
                  pl.BlockSpec((kdim, c), lambda i: (0, 0)),
                  pl.BlockSpec((1, c), lambda i: (0, 0)),
                  pl.BlockSpec((1, c), lambda i: (0, 0))],
        out_specs=pl.BlockSpec((tm, c), lambda i: (i, 0)),
        out_shape=jax.ShapeDtypeStruct((r, c), jnp.bfloat16),
        compiler_params=pltpu.CompilerParams(
            dimension_semantics=("parallel",), vmem_limit_bytes=_VMEM_LIMIT),
    )(x, w, s, b)


def _dw_stride1(x, w, s, b):
    # TODO(synk): for very large planes this per-image kernel could additionally be row-strip
    # tiled at the grid level (halo DMA with memory_space=pl.ANY) to bound VMEM further and
    # expose a second megacore axis; per-image VMEM fits all B4 stages at 380x380 as-is.
    n, h, ww, c = x.shape
    kk = w.shape[0]
    k = int(round(math.sqrt(kk)))
    pad = (k - 1) // 2
    strip = _strip_rows(h, ww, c)
    kernel = functools.partial(_dw_s1_kernel, k=k, strip=strip)
    return pl.pallas_call(
        kernel,
        grid=(n,),
        in_specs=[pl.BlockSpec((None, h, ww, c), lambda i: (i, 0, 0, 0)),
                  pl.BlockSpec((kk, c), lambda i: (0, 0)),
                  pl.BlockSpec((1, c), lambda i: (0, 0)),
                  pl.BlockSpec((1, c), lambda i: (0, 0))],
        out_specs=[pl.BlockSpec((None, h, ww, c), lambda i: (i, 0, 0, 0)),
                   pl.BlockSpec((None, 1, c), lambda i: (i, 0, 0))],
        out_shape=(jax.ShapeDtypeStruct((n, h, ww, c), jnp.bfloat16),
                   jax.ShapeDtypeStruct((n, 1, c), jnp.float32)),
        scratch_shapes=[pltpu.VMEM((h + 2 * pad, ww + 2 * pad, c), jnp.bfloat16)],
        compiler_params=pltpu.CompilerParams(
            dimension_semantics=("parallel",), vmem_limit_bytes=_VMEM_LIMIT),
    )(x, w, s, b)


def _phase_split(x, k):
    """(N,H,W,C) -> (N, 4, ceil(Hp/2), ceil(Wp/2), C) stride-2 phase planes of the padded input."""
    pad = (k - 1) // 2
    n, h, w, c = x.shape
    hp, wp = h + 2 * pad, w + 2 * pad
    ho = (hp - k) // 2 + 1
    wo = (wp - k) // 2 + 1
    hp2, wp2 = (hp + 1) // 2, (wp + 1) // 2
    xp = jnp.pad(x, ((0, 0), (pad, pad + 2 * hp2 - hp), (pad, pad + 2 * wp2 - wp), (0, 0)))
    phases = jnp.stack([xp[:, r::2, s::2, :] for r in (0, 1) for s in (0, 1)], axis=1)
    return phases, ho, wo


def _dw_stride2(x, w, s, b):
    kk = w.shape[0]
    k = int(round(math.sqrt(kk)))
    phases, ho, wo = _phase_split(x, k)
    n, _, hp2, wp2, c = phases.shape
    strip = _strip_rows(ho, wo, c)
    kernel = functools.partial(_dw_s2_kernel, k=k, ho=ho, wo=wo, strip=strip)
    return pl.pallas_call(
        kernel,
        grid=(n,),
        in_specs=[pl.BlockSpec((None, 4, hp2, wp2, c), lambda i: (i, 0, 0, 0, 0)),
                  pl.BlockSpec((kk, c), lambda i: (0, 0)),
                  pl.BlockSpec((1, c), lambda i: (0, 0)),
                  pl.BlockSpec((1, c), lambda i: (0, 0))],
        out_specs=[pl.BlockSpec((None, ho, wo, c), lambda i: (i, 0, 0, 0)),
                   pl.BlockSpec((None, 1, c), lambda i: (i, 0, 0))],
        out_shape=(jax.ShapeDtypeStruct((n, ho, wo, c), jnp.bfloat16),
                   jax.ShapeDtypeStruct((n, 1, c), jnp.float32)),
        compiler_params=pltpu.CompilerParams(
            dimension_semantics=("parallel",), vmem_limit_bytes=_VMEM_LIMIT),
    )(phases, w, s, b)


def _se_fc(pooled, w1, b1, w2, b2):
    n, c = pooled.shape
    return pl.pallas_call(
        _se_fc_kernel,
        out_shape=jax.ShapeDtypeStruct((n, c), jnp.bfloat16),
    )(pooled, w1, b1, w2, b2)


def _proj(x3, g3, w, s, b):
    n, hw, cin = x3.shape
    cout = w.shape[1]
    t = _row_tile(hw)
    # TODO(synk): narrow Cout (24/32/56/112) emits masked partial stores; consuming the
    # projection directly in the next block's expand (block-level fusion) would avoid it.
    return pl.pallas_call(
        _proj_kernel,
        grid=(n, pl.cdiv(hw, t)),
        in_specs=[pl.BlockSpec((None, t, cin), lambda i, j: (i, j, 0)),
                  pl.BlockSpec((None, 1, cin), lambda i, j: (i, 0, 0)),
                  pl.BlockSpec((cin, cout), lambda i, j: (0, 0)),
                  pl.BlockSpec((1, cout), lambda i, j: (0, 0)),
                  pl.BlockSpec((1, cout), lambda i, j: (0, 0))],
        out_specs=pl.BlockSpec((None, t, cout), lambda i, j: (i, j, 0)),
        out_shape=jax.ShapeDtypeStruct((n, hw, cout), jnp.bfloat16),
        compiler_params=pltpu.CompilerParams(
            dimension_semantics=("parallel", "parallel"), vmem_limit_bytes=_VMEM_LIMIT),
    )(x3, g3, w, s, b)


def _proj_res(x3, g3, w, s, b, r3):
    n, hw, cin = x3.shape
    cout = w.shape[1]
    t = _row_tile(hw)
    return pl.pallas_call(
        _proj_res_kernel,
        grid=(n, pl.cdiv(hw, t)),
        in_specs=[pl.BlockSpec((None, t, cin), lambda i, j: (i, j, 0)),
                  pl.BlockSpec((None, 1, cin), lambda i, j: (i, 0, 0)),
                  pl.BlockSpec((cin, cout), lambda i, j: (0, 0)),
                  pl.BlockSpec((1, cout), lambda i, j: (0, 0)),
                  pl.BlockSpec((1, cout), lambda i, j: (0, 0)),
                  pl.BlockSpec((None, t, cout), lambda i, j: (i, j, 0))],
        out_specs=pl.BlockSpec((None, t, cout), lambda i, j: (i, j, 0)),
        out_shape=jax.ShapeDtypeStruct((n, hw, cout), jnp.bfloat16),
        compiler_params=pltpu.CompilerParams(
            dimension_semantics=("parallel", "parallel"), vmem_limit_bytes=_VMEM_LIMIT),
    )(x3, g3, w, s, b, r3)


def _pool_fc(x, w, b):
    n, hw, c = x.shape
    nc = w.shape[1]
    return pl.pallas_call(
        _pool_fc_kernel,
        grid=(n,),
        in_specs=[pl.BlockSpec((None, hw, c), lambda i: (i, 0, 0)),
                  pl.BlockSpec((c, nc), lambda i: (0, 0)),
                  pl.BlockSpec((1, nc), lambda i: (0, 0))],
        out_specs=pl.BlockSpec((None, 1, nc), lambda i: (i, 0, 0)),
        out_shape=jax.ShapeDtypeStruct((n, 1, nc), jnp.float32),
        compiler_params=pltpu.CompilerParams(
            dimension_semantics=("parallel",), vmem_limit_bytes=_VMEM_LIMIT),
    )(x, w, b)


mm_silu = jax.jit(_mm_affine_silu)
dw_stride1 = jax.jit(_dw_stride1)
dw_stride2 = jax.jit(_dw_stride2)
se_fc = jax.jit(_se_fc)
proj = jax.jit(_proj)
proj_res = jax.jit(_proj_res)
pool_fc = jax.jit(_pool_fc)


# ---------------------------------------------------------------------------
# EfficientNet-B4 architecture (torchvision scaling: width 1.4, depth 1.8)
# ---------------------------------------------------------------------------

_B4_WIDTH, _B4_DEPTH = 1.4, 1.8
# (expand_ratio, kernel, stride, base_in, base_out, base_layers) -- B0 stage config
_BASE_CFG = [
    (1, 3, 1, 32, 16, 1),
    (6, 3, 2, 16, 24, 2),
    (6, 5, 2, 24, 40, 2),
    (6, 3, 2, 40, 80, 3),
    (6, 5, 1, 80, 112, 3),
    (6, 5, 2, 112, 192, 4),
    (6, 3, 1, 192, 320, 1),
]


def _make_divisible(v, divisor=8, min_value=None):
    if min_value is None:
        min_value = divisor
    new_v = max(min_value, int(v + divisor / 2) // divisor * divisor)
    if new_v < 0.9 * v:
        new_v += divisor
    return new_v


class _Keys:
    def __init__(self, seed):
        self._key = jax.random.PRNGKey(seed)

    def __call__(self):
        self._key, k = jax.random.split(self._key)
        return k


def _conv_w(kg, fan_in, fan_out, dtype=jnp.bfloat16):
    w = jax.random.normal(kg(), (fan_in, fan_out), jnp.float32) * math.sqrt(2.0 / fan_in)
    return w.astype(dtype)


def _bn(kg, c, eps=1e-5):
    gamma = jax.random.uniform(kg(), (c,), jnp.float32, 0.9, 1.1)
    beta = 0.01 * jax.random.normal(kg(), (c,), jnp.float32)
    mean = 0.01 * jax.random.normal(kg(), (c,), jnp.float32)
    var = jax.random.uniform(kg(), (c,), jnp.float32, 0.9, 1.1)
    scale = gamma / jnp.sqrt(var + eps)
    bias = beta - mean * scale
    return scale.reshape(1, c), bias.reshape(1, c)


def init_efficientnet_b4_params(num_classes, seed=0):
    kg = _Keys(seed)
    adj_c = lambda c: _make_divisible(c * _B4_WIDTH)
    adj_d = lambda d: int(math.ceil(d * _B4_DEPTH))

    params = {"num_classes": num_classes}
    stem_out = adj_c(32)                                      # 48
    params["stem_w"] = _conv_w(kg, 3 * 3 * 3, stem_out)
    params["stem_s"], params["stem_b"] = _bn(kg, stem_out)

    blocks = []
    cin = stem_out
    for (e, k, s, _ci, co, n) in _BASE_CFG:
        cout = adj_c(co)
        for i in range(adj_d(n)):
            b_in = cin if i == 0 else cout
            stride = s if i == 0 else 1
            exp = b_in * e
            sq = max(1, b_in // 4)
            blk = {"k": k, "stride": stride,
                   "use_res": (stride == 1 and b_in == cout)}
            if exp != b_in:
                blk["expand_w"] = _conv_w(kg, b_in, exp)
                blk["expand_s"], blk["expand_b"] = _bn(kg, exp)
            blk["dw_w"] = _conv_w(kg, k * k, exp, jnp.float32)
            blk["dw_s"], blk["dw_b"] = _bn(kg, exp)
            blk["se_w1"] = _conv_w(kg, exp, sq, jnp.float32)
            blk["se_b1"] = jnp.zeros((1, sq), jnp.float32)
            blk["se_w2"] = _conv_w(kg, sq, exp, jnp.float32)
            blk["se_b2"] = jnp.zeros((1, exp), jnp.float32)
            blk["proj_w"] = _conv_w(kg, exp, cout)
            blk["proj_s"], blk["proj_b"] = _bn(kg, cout)
            blocks.append(blk)
        cin = cout
    params["blocks"] = blocks

    head_out = 4 * cin                                        # 1792
    params["head_w"] = _conv_w(kg, cin, head_out)
    params["head_s"], params["head_b"] = _bn(kg, head_out)
    nc_pad = max(128, ((num_classes + 127) // 128) * 128)     # lane-friendly classifier width
    params["fc_w"] = _conv_w(kg, head_out, nc_pad, jnp.float32)
    params["fc_b"] = jnp.zeros((1, nc_pad), jnp.float32)
    return params


# ---------------------------------------------------------------------------
# Forward pass
# ---------------------------------------------------------------------------

def _im2col_lastdim(x, k, stride, pad):
    """(N,H,W,C) -> (N*Ho*Wo, k*k*C) patches (used for the 3-channel stem conv only)."""
    n, h, w, c = x.shape
    xp = jnp.pad(x, ((0, 0), (pad, pad), (pad, pad), (0, 0)))
    ho = (h + 2 * pad - k) // stride + 1
    wo = (w + 2 * pad - k) // stride + 1
    cols = []
    for di in range(k):
        for dj in range(k):
            cols.append(xp[:, di:di + stride * ho:stride, dj:dj + stride * wo:stride, :])
    p = jnp.stack(cols, axis=3)                               # (N, Ho, Wo, KK, C)
    return p.reshape(n * ho * wo, k * k * c), ho, wo


def _mbconv(blk, x):
    # TODO(synk): expand->dw->SE->proj could be fused into a single spatially-tiled
    # pallas_call keeping the 6x-expanded tensor entirely in VMEM; kept as separate
    # bf16 kernels here (padding / pooling already fused, no im2col blow-up).
    n, h, w, c = x.shape
    res = x
    if "expand_w" in blk:                                     # 1x1 expand conv + BN + SiLU
        y = mm_silu(x.reshape(n * h * w, c), blk["expand_w"], blk["expand_s"], blk["expand_b"])
        x = y.reshape(n, h, w, -1)
    cexp = x.shape[-1]
    if blk["stride"] == 1:
        y4, pooled = dw_stride1(x, blk["dw_w"], blk["dw_s"], blk["dw_b"])
    else:
        y4, pooled = dw_stride2(x, blk["dw_w"], blk["dw_s"], blk["dw_b"])
    ho, wo = y4.shape[1], y4.shape[2]
    y3 = y4.reshape(n, ho * wo, cexp)
    gate = se_fc(pooled.reshape(n, cexp),
                 blk["se_w1"], blk["se_b1"], blk["se_w2"], blk["se_b2"])
    g3 = gate.reshape(n, 1, cexp)                             # per-image gate, no HBM row-broadcast
    if blk["use_res"]:
        # TODO(synk): stochastic depth is identity in eval mode and is omitted.
        out = proj_res(y3, g3, blk["proj_w"], blk["proj_s"], blk["proj_b"],
                       res.reshape(n, ho * wo, -1))
    else:
        out = proj(y3, g3, blk["proj_w"], blk["proj_s"], blk["proj_b"])
    return out.reshape(n, ho, wo, -1)


def efficientnet_b4_forward(params, x_nchw):
    x = jnp.transpose(x_nchw, (0, 2, 3, 1)).astype(jnp.bfloat16)    # NCHW -> NHWC, bf16
    n = x.shape[0]
    # Stem: 3x3 conv stride 2 pad 1 + BN + SiLU (im2col + MXU matmul kernel)
    p, ho, wo = _im2col_lastdim(x, 3, 2, 1)
    y = mm_silu(p, params["stem_w"], params["stem_s"], params["stem_b"])
    x = y.reshape(n, ho, wo, -1)
    # 32 MBConv blocks
    for blk in params["blocks"]:
        x = _mbconv(blk, x)
    # Head: 1x1 conv to 1792 + BN + SiLU
    n, h, w, c = x.shape
    y = mm_silu(x.reshape(n * h * w, c), params["head_w"], params["head_s"], params["head_b"])
    # TODO(synk): classifier Dropout(p=0.4) is identity in eval mode and is omitted.
    logits = pool_fc(y.reshape(n, h * w, -1), params["fc_w"], params["fc_b"])
    return logits[:, 0, :params["num_classes"]]


if __name__ == "__main__":
    num_classes = 10
    params = init_efficientnet_b4_params(num_classes, seed=0)
    x = jax.random.normal(jax.random.PRNGKey(0), (2, 3, 32, 32), jnp.float32)   # NCHW like PyTorch
    logits = efficientnet_b4_forward(params, x)
    logits = jax.block_until_ready(logits)
    assert logits.shape == (2, num_classes)
    assert bool(jnp.all(jnp.isfinite(logits.astype(jnp.float32))))
    print("KERNEL_OK")
</pallas_src>

<mosaic_0001>
module attributes {stable_mosaic.version = 11 : i64} {
  func.func @_mm_affine_silu_kernel(%arg0: i32, %arg1: memref<512x27xbf16, #tpu.memory_space<vmem>>, %arg2: memref<27x48xbf16, #tpu.memory_space<vmem>>, %arg3: memref<1x48xf32, #tpu.memory_space<vmem>>, %arg4: memref<1x48xf32, #tpu.memory_space<vmem>>, %arg5: memref<512x48xbf16, #tpu.memory_space<vmem>>) attributes {dimension_semantics = [#tpu.dimension_semantics<parallel>], iteration_bounds = array<i64: 1>, scalar_prefetch = 0 : i64, scratch_operands = 0 : i64, tpu.core_type = #tpu.core_type<tc>, window_params = [{transform_indices = @transform_0, window_bounds = array<i64: 512, 27>}, {pipeline_mode = #tpu.pipeline_mode<synchronous>, transform_indices = @transform_1, window_bounds = array<i64: 27, 48>}, {pipeline_mode = #tpu.pipeline_mode<synchronous>, transform_indices = @transform_2, window_bounds = array<i64: 1, 48>}, {pipeline_mode = #tpu.pipeline_mode<synchronous>, transform_indices = @transform_3, window_bounds = array<i64: 1, 48>}, {transform_indices = @transform_4, window_bounds = array<i64: 512, 48>}]} {
    %c0 = arith.constant 0 : index
    %c0_0 = arith.constant 0 : index
    %0 = vector.load %arg1[%c0, %c0_0] : memref<512x27xbf16, #tpu.memory_space<vmem>>, vector<512x27xbf16>
    %c0_1 = arith.constant 0 : index
    %c0_2 = arith.constant 0 : index
    %1 = vector.load %arg2[%c0_1, %c0_2] : memref<27x48xbf16, #tpu.memory_space<vmem>>, vector<27x48xbf16>
    %cst = arith.constant dense<0.000000e+00> : vector<512x48xf32>
    %2 = tpu.matmul %0, %1, %cst {dimension_numbers = #tpu.dot_dimension_numbers<[1], [0], [0], [1], [0, 0, 1, 1], [], []>} : vector<512x27xbf16>, vector<27x48xbf16>, vector<512x48xf32> -> vector<512x48xf32>
    %c0_3 = arith.constant 0 : index
    %c0_4 = arith.constant 0 : index
    %3 = vector.load %arg3[%c0_3, %c0_4] : memref<1x48xf32, #tpu.memory_space<vmem>>, vector<1x48xf32>
    %4 = vector.broadcast %3 : vector<1x48xf32> to vector<512x48xf32>
    %5 = arith.mulf %2, %4 : vector<512x48xf32>
    %c0_5 = arith.constant 0 : index
    %c0_6 = arith.constant 0 : index
    %6 = vector.load %arg4[%c0_5, %c0_6] : memref<1x48xf32, #tpu.memory_space<vmem>>, vector<1x48xf32>
    %7 = vector.broadcast %6 : vector<1x48xf32> to vector<512x48xf32>
    %8 = arith.addf %5, %7 : vector<512x48xf32>
    %9 = arith.negf %8 : vector<512x48xf32>
    %10 = math.exp %9 : vector<512x48xf32>
    %cst_7 = arith.constant 1.000000e+00 : f32
    %11 = vector.broadcast %cst_7 : f32 to vector<512x48xf32>
    %12 = arith.addf %11, %10 : vector<512x48xf32>
    %13 = arith.divf %11, %12 : vector<512x48xf32>
    %14 = arith.mulf %8, %13 : vector<512x48xf32>
    %15 = arith.truncf %14 : vector<512x48xf32> to vector<512x48xbf16>
    %c0_8 = arith.constant 0 : index
    %c0_9 = arith.constant 0 : index
    %16 = vector.load %arg5[%c0_8, %c0_9] : memref<512x48xbf16, #tpu.memory_space<vmem>>, vector<512x48xbf16>
    tpu.vector_store %arg5[%c0_8, %c0_9], %15 {strides = array<i32>} : memref<512x48xbf16, #tpu.memory_space<vmem>>, vector<512x48xbf16>,
    return
  }
  func.func @transform_0(%arg0: i32) -> (i32, i32) {
    %c0_i32 = arith.constant 0 : i32
    %c0_i32_0 = arith.constant 0 : i32
    return %arg0, %c0_i32 : i32, i32
  }
  func.func @transform_1(%arg0: i32) -> (i32, i32) {
    %c0_i32 = arith.constant 0 : i32
    %c0_i32_0 = arith.constant 0 : i32
    %c0_i32_1 = arith.constant 0 : i32
    return %c0_i32, %c0_i32_0 : i32, i32
  }
  func.func @transform_2(%arg0: i32) -> (i32, i32) {
    %c0_i32 = arith.constant 0 : i32
    %c0_i32_0 = arith.constant 0 : i32
    %c0_i32_1 = arith.constant 0 : i32
    return %c0_i32, %c0_i32_0 : i32, i32
  }
  func.func @transform_3(%arg0: i32) -> (i32, i32) {
    %c0_i32 = arith.constant 0 : i32
    %c0_i32_0 = arith.constant 0 : i32
    %c0_i32_1 = arith.constant 0 : i32
    return %c0_i32, %c0_i32_0 : i32, i32
  }
  func.func @transform_4(%arg0: i32) -> (i32, i32) {
    %c0_i32 = arith.constant 0 : i32
    %c0_i32_0 = arith.constant 0 : i32
    return %arg0, %c0_i32 : i32, i32
  }
}

</mosaic_0001>

<bundles_post_ra>
// kernel: _mm_affine_silu.1
= control target key start
LH: loop header
LB: loop body
LE: loop exit
PB: predicated region body
PF: predicated region fallthrough
CT: control target
= control target key end

     0   :  { %vm354_vm0 = vcmask 1044480   ;;  %vm355_vm1 = vcmask 1045504   ;;  %vm257_vm2 = vcmask 220160   ;;  %v2224_v1 = vmov 65535   ;;  %s3173_s1 = inlined_call_operand.vmem [shape: bf16[27,48], index: 1, kind: input, shape index: {}]   ;;  %s3174_s0 = inlined_call_operand.vmem [shape: bf16[512,27], index: 0, kind: input, shape index: {}]   ;;  %s3175_s2 = inlined_call_operand.vmem [shape: f32[1,48], index: 2, kind: input, shape index: {}]   ;;  %s3176_s3 = inlined_call_operand.vmem [shape: f32[1,48], index: 3, kind: input, shape index: {}]   ;;  %s3177_s4 = inlined_call_operand.vmem [shape: bf16[512,48], index: 4, kind: output, shape index: {}]  }
   0x1   :  { %v1932_v0 = vld [vmem:[%s3173_s1] sm:$0xff]   ;;  %v356_v2 = vsel %vm354_vm0, 4294967295, %v2224_v1  ;;  %v1933_v3 = vld [vmem:[%s3173_s1 + $0x8] sm:$0x3f]   ;;  %v1938_v10 = vld [vmem:[%s3174_s0 + $0x10] sm:$0xff]   ;;  %vm1496_vm3 = vcmask 388096  }
   0x2   :  { %1859 = vmatprep.subr.bf16.mxu0 %v1932_v0  ;;  %1927 = vmatprep.subr.bf16.mxu1 %v1932_v0  ;;  %v357_v4 = vsel %vm355_vm1, %v356_v2, 0  ;;  %v1934_v5 = vld [vmem:[%s3174_s0] sm:$0xff]   ;;  %v1936_v8 = vld [vmem:[%s3174_s0 + $0x8] sm:$0xff]   ;;  %v1939_v11 = vld [vmem:[%s3174_s0 + $0x90] sm:$0xff]  }
   0x3   :  { %1860 = vmatpush3.bf16.msra.mxu0 %v1932_v0  ;;  %1929 = vmatpush3.bf16.msra.mxu1 %v1932_v0  ;;  %v359_v6 = vand.u32 %v1933_v3, %v357_v4  ;;  %v1935_v7 = vld [vmem:[%s3174_s0 + $0x80] sm:$0xff]   ;;  %v1937_v9 = vld [vmem:[%s3174_s0 + $0x88] sm:$0xff]   ;;  %v1940_v12 = vld [vmem:[%s3174_s0 + $0x18] sm:$0xff]  }
   0x4   :  { %1863 = vmatprep.mubr.msk.bf16.mxu0 %vm257_vm2, %v1934_v5  ;;  %1895 = vmatprep.mubr.msk.bf16.mxu1 %vm257_vm2, %v1935_v7  ;;  %v1941_v13 = vld [vmem:[%s3174_s0 + $0x98] sm:$0xff]   ;;  %v1942_v14 = vld [vmem:[%s3174_s0 + $0x20] sm:$0xff]   ;;  %v1944_v16 = vld [vmem:[%s3174_s0 + $0x28] sm:$0xff]  }
   0x5   :  { %1861 = vmatprep.subr.bf16.mxu0 %v359_v6  ;;  %1928 = vmatprep.subr.bf16.mxu1 %v359_v6  ;;  %v1943_v15 = vld [vmem:[%s3174_s0 + $0xa0] sm:$0xff]   ;;  %v1945_v17 = vld [vmem:[%s3174_s0 + $0xa8] sm:$0xff]   ;;  %v1946_v18 = vld [vmem:[%s3174_s0 + $0x30] sm:$0xff]  }
   0x6   :  { %v1947_v19 = vld [vmem:[%s3174_s0 + $0xb0] sm:$0xff]   ;;  %v1948_v20 = vld [vmem:[%s3174_s0 + $0x38] sm:$0xff]   ;;  %v1950_v22 = vld [vmem:[%s3174_s0 + $0x40] sm:$0xff]  }
   0x7   :  { %1862 = vmatpush3.bf16.msra.mxu0 %v359_v6  ;;  %1930 = vmatpush3.bf16.msra.mxu1 %v359_v6  ;;  %v1949_v21 = vld [vmem:[%s3174_s0 + $0xb8] sm:$0xff]   ;;  %v1951_v23 = vld [vmem:[%s3174_s0 + $0xc0] sm:$0xff]   ;;  %v1952_v24 = vld [vmem:[%s3174_s0 + $0x48] sm:$0xff]  }
   0x8   :  { %v1953_v25 = vld [vmem:[%s3174_s0 + $0xc8] sm:$0xff]   ;;  %v1954_v26 = vld [vmem:[%s3174_s0 + $0x50] sm:$0xff]   ;;  %v1956_v28 = vld [vmem:[%s3174_s0 + $0x58] sm:$0xff]  }
   0x9   :  { %v1955_v27 = vld [vmem:[%s3174_s0 + $0xd0] sm:$0xff]   ;;  %v1957_v29 = vld [vmem:[%s3174_s0 + $0xd8] sm:$0xff]   ;;  %v1958_v30 = vld [vmem:[%s3174_s0 + $0x60] sm:$0xff]  }
   0xa   :  { %1864 = vmatmul.mubr.msk.bf16.vlgmr.msra.gmra.mrb[0].mxu0 %vm257_vm2, %v1936_v8  ;;  %1896 = vmatmul.mubr.msk.bf16.vlgmr.msra.gmra.mrb[0].mxu1 %vm257_vm2, %v1937_v9  ;;  %v1959_v31 = vld [vmem:[%s3174_s0 + $0xe0] sm:$0xff]   ;;  %v1960_v32 = vld [vmem:[%s3174_s0 + $0x68] sm:$0xff]   ;;  %v1962_v34 = vld [vmem:[%s3174_s0 + $0x70] sm:$0xff]  }
   0xb   :  { %1867 = vmatprep.mubr.msk.bf16.mxu0 %vm257_vm2, %v1938_v10  ;;  %1899 = vmatprep.mubr.msk.bf16.mxu1 %vm257_vm2, %v1939_v11  ;;  %v1961_v33 = vld [vmem:[%s3174_s0 + $0xe8] sm:$0xff]   ;;  %v1963_v35 = vld [vmem:[%s3174_s0 + $0xf0] sm:$0xff]   ;;  %v1964_v36 = vld [vmem:[%s3174_s0 + $0x78] sm:$0xff]  }
   0xc   :  { %v1965_v37 = vld [vmem:[%s3174_s0 + $0xf8] sm:$0xff]   ;;  %v2387_v38 = vld [vmem:[%s3175_s2] ss:$0 sm:$0xff] }
   0xd   :  { %v2392_v40 = vld [vmem:[%s3176_s3] ss:$0 sm:$0xff] }
  0x12   :  { %1868 = vmatmul.mubr.msk.bf16.gmra.mrb[4].mxu0 %vm257_vm2, %v1940_v12  ;;  %1900 = vmatmul.mubr.msk.bf16.gmra.mrb[4].mxu1 %vm257_vm2, %v1941_v13 }
  0x13   :  { %1871 = vmatprep.mubr.msk.bf16.mxu0 %vm257_vm2, %v1942_v14  ;;  %1903 = vmatprep.mubr.msk.bf16.mxu1 %vm257_vm2, %v1943_v15 }
  0x1a   :  { %1872 = vmatmul.mubr.msk.bf16.gmra.mrb[8].mxu0 %vm257_vm2, %v1944_v16  ;;  %1904 = vmatmul.mubr.msk.bf16.gmra.mrb[8].mxu1 %vm257_vm2, %v1945_v17 }
  0x1b   :  { %1875 = vmatprep.mubr.msk.bf16.mxu0 %vm257_vm2, %v1946_v18  ;;  %1907 = vmatprep.mubr.msk.bf16.mxu1 %vm257_vm2, %v1947_v19 }
  0x22   :  { %1876 = vmatmul.mubr.msk.bf16.gmra.mrb[12].mxu0 %vm257_vm2, %v1948_v20  ;;  %1908 = vmatmul.mubr.msk.bf16.gmra.mrb[12].mxu1 %vm257_vm2, %v1949_v21 }
  0x23   :  { %1879 = vmatprep.mubr.msk.bf16.mxu0 %vm257_vm2, %v1950_v22  ;;  %1911 = vmatprep.mubr.msk.bf16.mxu1 %vm257_vm2, %v1951_v23 }
  0x2a   :  { %1880 = vmatmul.mubr.msk.bf16.gmra.mrb[16].mxu0 %vm257_vm2, %v1952_v24  ;;  %1912 = vmatmul.mubr.msk.bf16.gmra.mrb[16].mxu1 %vm257_vm2, %v1953_v25 }
  0x2b   :  { %1883 = vmatprep.mubr.msk.bf16.mxu0 %vm257_vm2, %v1954_v26  ;;  %1915 = vmatprep.mubr.msk.bf16.mxu1 %vm257_vm2, %v1955_v27 }
  0x32   :  { %1884 = vmatmul.mubr.msk.bf16.gmra.mrb[20].mxu0 %vm257_vm2, %v1956_v28  ;;  %1916 = vmatmul.mubr.msk.bf16.gmra.mrb[20].mxu1 %vm257_vm2, %v1957_v29 }
  0x33   :  { %1887 = vmatprep.mubr.msk.bf16.mxu0 %vm257_vm2, %v1958_v30  ;;  %1919 = vmatprep.mubr.msk.bf16.mxu1 %vm257_vm2, %v1959_v31 }
  0x3a   :  { %1888 = vmatmul.mubr.msk.bf16.gmra.mrb[24].mxu0 %vm257_vm2, %v1960_v32  ;;  %1920 = vmatmul.mubr.msk.bf16.gmra.mrb[24].mxu1 %vm257_vm2, %v1961_v33 }
  0x3b   :  { %1891 = vmatprep.mubr.msk.bf16.mxu0 %vm257_vm2, %v1962_v34  ;;  %1923 = vmatprep.mubr.msk.bf16.mxu1 %vm257_vm2, %v1963_v35 }
  0x42   :  { %1892 = vmatmul.mubr.msk.bf16.gmra.mrb[28].mxu0 %vm257_vm2, %v1964_v36  ;;  %1924 = vmatmul.mubr.msk.bf16.gmra.mrb[28].mxu1 %vm257_vm2, %v1965_v37 }
  0xdd   :  { %v1865_v39 = vpop.f32.mrb[0].mxu0  ;;  %v1897_v41 = vpop.f32.mrb[0].mxu1 }
  0xde   :  { %v659_v42 = vmul.f32 %v1865_v39, %v2387_v38  ;;  %v691_v43 = vmul.f32 %v1897_v41, %v2387_v38  ;;  %v395_v44 = vpop.f32.mrb[1].mxu0  ;;  %v523_v45 = vpop.f32.mrb[1].mxu1 }
  0xdf   :  { %v657_v46 = vmul.f32 %v2387_v38, %v395_v44  ;;  %v689_v47 = vmul.f32 %v2387_v38, %v523_v45  ;;  %v1866_v48 = vpop.f32.mrb[2].mxu0  ;;  %v1898_v49 = vpop.f32.mrb[2].mxu1 }
  0xe0   :  { %v2399_v50 = vadd.f32 %v2392_v40, %v659_v42  ;;  %v2402_v51 = vadd.f32 %v2392_v40, %v691_v43  ;;  %v660_v52 = vmul.f32 %v1866_v48, %v2387_v38  ;;  %v692_v53 = vmul.f32 %v1898_v49, %v2387_v38  ;;  %v398_v54 = vpop.f32.mrb[3].mxu0  ;;  %v526_v55 = vpop.f32.mrb[3].mxu1 }
  0xe1   :  { %v2407_v56 = vadd.f32 %v2392_v40, %v657_v46  ;;  %v2410_v57 = vadd.f32 %v2392_v40, %v689_v47  ;;  %v658_v58 = vmul.f32 %v2387_v38, %v398_v54  ;;  %v690_v59 = vmul.f32 %v2387_v38, %v526_v55 }
  0xe2   :  { %v1635_v60 = vmul.f32 -1.442695, %v2399_v50  ;;  %v1667_v61 = vmul.f32 -1.442695, %v2402_v51  ;;  %v2417_v62 = vadd.f32 %v2392_v40, %v660_v52  ;;  %v2420_v63 = vadd.f32 %v2392_v40, %v692_v53 }
  0xe3   :  { %v1633_v0 = vmul.f32 -1.442695, %v2407_v56  ;;  %v1665_v1 = vmul.f32 -1.442695, %v2410_v57  ;;  %v2425_v2 = vadd.f32 %v2392_v40, %v658_v58  ;;  %v2428_v3 = vadd.f32 %v2392_v40, %v690_v59 }
  0xe4   :  { %1966 = vpow2.f32 %v1635_v60  ;;  %v1636_v4 = vmul.f32 -1.442695, %v2417_v62  ;;  %v1668_v5 = vmul.f32 -1.442695, %v2420_v63 }
  0xe5   :  { %1968 = vpow2.f32 %v1667_v61  ;;  %v1869_v6 = vpop.f32.mrb[4].mxu0  ;;  %v1901_v7 = vpop.f32.mrb[4].mxu1  ;;  %v1634_v8 = vmul.f32 -1.442695, %v2425_v2  ;;  %v1666_v13 = vmul.f32 -1.442695, %v2428_v3 }
  0xe6   :  { %1970 = vpow2.f32 %v1633_v0  ;;  %v663_v9 = vmul.f32 %v1869_v6, %v2387_v38  ;;  %v695_v10 = vmul.f32 %v1901_v7, %v2387_v38  ;;  %v411_v11 = vpop.f32.mrb[5].mxu0  ;;  %v539_v12 = vpop.f32.mrb[5].mxu1 }
  0xe7   :  { %1972 = vpow2.f32 %v1665_v1  ;;  %v661_v14 = vmul.f32 %v2387_v38, %v411_v11  ;;  %v693_v15 = vmul.f32 %v2387_v38, %v539_v12  ;;  %v1870_v16 = vpop.f32.mrb[6].mxu0  ;;  %v1902_v17 = vpop.f32.mrb[6].mxu1 }
  0xe8   :  { %1974 = vpow2.f32 %v1636_v4  ;;  %v2439_v18 = vadd.f32 %v2392_v40, %v663_v9  ;;  %v2442_v19 = vadd.f32 %v2392_v40, %v695_v10  ;;  %v664_v20 = vmul.f32 %v1870_v16, %v2387_v38  ;;  %v414_v21 = vpop.f32.mrb[7].mxu0  ;;  %v542_v22 = vpop.f32.mrb[7].mxu1 }
  0xe9   :  { %1976 = vpow2.f32 %v1668_v5  ;;  %v2446_v23 = vadd.f32 %v2392_v40, %v661_v14  ;;  %v2449_v24 = vadd.f32 %v2392_v40, %v693_v15  ;;  %v696_v25 = vmul.f32 %v1902_v17, %v2387_v38 }
  0xea   :  { %1978 = vpow2.f32 %v1634_v8  ;;  %v1639_v26 = vmul.f32 -1.442695, %v2439_v18  ;;  %v1671_v27 = vmul.f32 -1.442695, %v2442_v19  ;;  %v2455_v28 = vadd.f32 %v2392_v40, %v664_v20 }
  0xeb   :  { %1980 = vpow2.f32 %v1666_v13  ;;  %v1637_v29 = vmul.f32 -1.442695, %v2446_v23  ;;  %v1669_v30 = vmul.f32 -1.442695, %v2449_v24  ;;  %v662_v32 = vmul.f32 %v2387_v38, %v414_v21 }
  0xec   :  { %1982 = vpow2.f32 %v1639_v26  ;;  %v1640_v31 = vmul.f32 -1.442695, %v2455_v28  ;;  %v2462_v33 = vadd.f32 %v2392_v40, %v696_v25  ;;  %v694_v37 = vmul.f32 %v2387_v38, %v542_v22 }
  0xed   :  { %1984 = vpow2.f32 %v1671_v27  ;;  %v1873_v34 = vpop.f32.mrb[8].mxu0  ;;  %v1905_v35 = vpop.f32.mrb[8].mxu1  ;;  %v2466_v44 = vadd.f32 %v2392_v40, %v662_v32 }
  0xee   :  { %v1967_v36 = vpop.eup %1966  ;;  %1986 = vpow2.f32 %v1637_v29  ;;  %v427_v39 = vpop.f32.mrb[9].mxu0  ;;  %v667_v49 = vmul.f32 %v1873_v34, %v2387_v38  ;;  %v699_v52 = vmul.f32 %v1905_v35, %v2387_v38  ;;  %v2471_v58 = vmul.f32 -1.442695, %v2462_v33 }
  0xef   :  { %v555_v41 = vpop.f32.mrb[9].mxu1  ;;  %v1969_v42 = vpop.eup %1968  ;;  %v986_v43 = vadd.f32 1.0, %v1967_v36  ;;  %1988 = vpow2.f32 %v1669_v30  ;;  %v2474_v0 = vadd.f32 %v2392_v40, %v694_v37  ;;  %v665_v1 = vmul.f32 %v2387_v38, %v427_v39 }
  0xf0   :  { %v1874_v45 = vpop.f32.mrb[10].mxu0  ;;  %v1906_v46 = vpop.f32.mrb[10].mxu1  ;;  %v1018_v48 = vadd.f32 1.0, %v1969_v42  ;;  %1990 = vpow2.f32 %v1640_v31  ;;  %v2478_v6 = vmul.f32 -1.442695, %v2466_v44  ;;  %v697_v7 = vmul.f32 %v2387_v38, %v555_v41 }
  0xf1   :  { %v1971_v47 = vpop.eup %1970  ;;  %v430_v53 = vpop.f32.mrb[11].mxu0  ;;  %1992 = vrcp.f32 %v986_v43  ;;  %v2482_v10 = vadd.f32 %v2392_v40, %v667_v49  ;;  %v2485_v11 = vadd.f32 %v2392_v40, %v699_v52  ;;  %v668_v14 = vmul.f32 %v1874_v45, %v2387_v38 }
  0xf2   :  { %v1973_v54 = vpop.eup %1972  ;;  %v984_v55 = vadd.f32 1.0, %v1971_v47  ;;  %v558_v59 = vpop.f32.mrb[11].mxu1  ;;  %1994 = vrcp.f32 %v1018_v48  ;;  %v700_v15 = vmul.f32 %v1906_v46, %v2387_v38  ;;  %v2490_v22 = vmul.f32 -1.442695, %v2474_v0 }
  0xf3   :  { %v1975_v60 = vpop.eup %1974  ;;  %v1016_v61 = vadd.f32 1.0, %v1973_v54  ;;  %v2493_v25 = vadd.f32 %v2392_v40, %v665_v1  ;;  %v2500_v31 = vadd.f32 %v2392_v40, %v697_v7  ;;  %v666_v32 = vmul.f32 %v2387_v38, %v430_v53 }
  0xf4   :  { %v1977_v4 = vpop.eup %1976  ;;  %1996 = vrcp.f32 %v984_v55  ;;  %v987_v5 = vadd.f32 1.0, %v1975_v60  ;;  %v1643_v39 = vmul.f32 -1.442695, %v2482_v10  ;;  %v2509_v41 = vadd.f32 %v2392_v40, %v668_v14 }
  0xf5   :  { %v1979_v8 = vpop.eup %1978  ;;  %1998 = vrcp.f32 %v1016_v61  ;;  %v1019_v9 = vadd.f32 1.0, %v1977_v4  ;;  %v1877_v16 = vpop.f32.mrb[12].mxu0  ;;  %v1675_v47 = vmul.f32 -1.442695, %v2485_v11  ;;  %v2517_v48 = vadd.f32 %v2392_v40, %v700_v15 }
  0xf6   :  { %v1981_v12 = vpop.eup %1980  ;;  %2000 = vrcp.f32 %v987_v5  ;;  %v985_v13 = vadd.f32 1.0, %v1979_v8  ;;  %v1909_v17 = vpop.f32.mrb[12].mxu1  ;;  %v1641_v53 = vmul.f32 -1.442695, %v2493_v25  ;;  %v698_v54 = vmul.f32 %v2387_v38, %v558_v59 }
  0xf7   :  { %v1983_v20 = vpop.eup %1982  ;;  %2002 = vrcp.f32 %v1019_v9  ;;  %v1017_v21 = vadd.f32 1.0, %v1981_v12  ;;  %v2495_v26 = vpop.f32.mrb[13].mxu0  ;;  %v1673_v61 = vmul.f32 -1.442695, %v2500_v31  ;;  %v2523_v1 = vadd.f32 %v2392_v40, %v666_v32 }
  0xf8   :  { %v2497_v27 = vpop.f32.mrb[13].mxu1  ;;  %v1985_v29 = vpop.eup %1984  ;;  %2004 = vrcp.f32 %v985_v13  ;;  %v990_v30 = vadd.f32 1.0, %v1983_v20  ;;  %v1644_v7 = vmul.f32 -1.442695, %v2509_v41  ;;  %v671_v8 = vmul.f32 %v1877_v16, %v2387_v38 }
  0xf9   :  { %v2503_v34 = vpop.f32.mrb[14].mxu0  ;;  %v2505_v35 = vpop.f32.mrb[14].mxu1  ;;  %2006 = vrcp.f32 %v1017_v21  ;;  %v1022_v37 = vadd.f32 1.0, %v1985_v29  ;;  %v1676_v59 = vmul.f32 -1.442695, %v2517_v48  ;;  %v703_v13 = vmul.f32 %v1909_v17, %v2387_v38 }
  0xfa   :  { %v1987_v36 = vpop.eup %1986  ;;  %v2511_v42 = vpop.f32.mrb[15].mxu0  ;;  %2008 = vrcp.f32 %v990_v30  ;;  %v2538_v16 = vadd.f32 %v2392_v40, %v698_v54 }
  0xfb   :  { %v2513_v43 = vpop.f32.mrb[15].mxu1  ;;  %v1989_v45 = vpop.eup %1988  ;;  %v988_v46 = vadd.f32 1.0, %v1987_v36  ;;  %2010 = vrcp.f32 %v1022_v37  ;;  %v1642_v36 = vmul.f32 -1.442695, %v2523_v1 }
  0xfc   :  { %v1991_v49 = vpop.eup %1990  ;;  %v1020_v52 = vadd.f32 1.0, %v1989_v45 }
  0xfd   :  { %v1993_v55 = vpop.eup %1992  ;;  %2012 = vrcp.f32 %v988_v46  ;;  %v991_v60 = vadd.f32 1.0, %v1991_v49  ;;  %v2531_v14 = vpop.f32.mrb[16].mxu0 }
  0xfe   :  { %v1995_v4 = vpop.eup %1994  ;;  %v1178_v5 = vmul.f32 %v1993_v55, %v2399_v50  ;;  %2014 = vrcp.f32 %v1020_v52  ;;  %v2533_v15 = vpop.f32.mrb[16].mxu1 }
  0xff   :  { %v1997_v9 = vpop.eup %1996  ;;  %v1210_v12 = vmul.f32 %v1995_v4, %v2402_v51  ;;  %2016 = vrcp.f32 %v991_v60  ;;  %v2540_v29 = vpop.f32.mrb[17].mxu0 }
 0x100   :  { %v1999_v20 = vpop.eup %1998  ;;  %v1763_v21 = vpack.c.bf16 %v1178_v5, %v1178_v5  ;;  %v1176_v50 = vmul.f32 %v1997_v9, %v2407_v56  ;;  %2018 = vpow2.f32 %v2471_v58  ;;  %v2542_v51 = vpop.f32.mrb[17].mxu1  ;;  %v1674_v5 = vmul.f32 -1.442695, %v2538_v16 }
 0x101   :  { %v2001_v30 = vpop.eup %2000  ;;  %v1795_v32 = vpack.c.bf16 %v1210_v12, %v1210_v12  ;;  %v1208_v17 = vmul.f32 %v1999_v20, %v2410_v57  ;;  %2020 = vpow2.f32 %v2478_v6  ;;  %v2547_v37 = vpop.f32.mrb[18].mxu0  ;;  %v2558_v57 = vadd.f32 %v2392_v40, %v671_v8 }
 0x102   :  { %v2549_v56 = vpop.f32.mrb[18].mxu1  ;;  %v2003_v58 = vpop.eup %2002  ;;  %1499 = vst.msk [vmem:[%s3177_s4 + $0x8] sm:$0xf] %vm1496_vm3, %v1763_v21  ;;  %v1761_v45 = vpack.c.bf16 %v1176_v50, %v1176_v50  ;;  %v1179_v46 = vmul.f32 %v2001_v30, %v2417_v62  ;;  %2022 = vpow2.f32 %v2490_v22  ;;  %v2570_v62 = vadd.f32 %v2392_v40, %v703_v13 }
 0x103   :  { %v2560_v6 = vpop.f32.mrb[19].mxu0  ;;  %v2562_v49 = vpop.f32.mrb[19].mxu1  ;;  %1531 = vst.msk [vmem:[%s3177_s4 + $0x88] sm:$0xf] %vm1496_vm3, %v1795_v32  ;;  %v1793_v54 = vpack.c.bf16 %v1208_v17, %v1208_v17  ;;  %v1211_v55 = vmul.f32 %v2003_v58, %v2420_v63  ;;  %2024 = vpow2.f32 %v1643_v39  ;;  %v669_v9 = vmul.f32 %v2387_v38, %v2495_v26 }
 0x104   :  { %v2005_v52 = vpop.eup %2004  ;;  %1497 = vst.msk [vmem:[%s3177_s4] sm:$0xf] %vm1496_vm3, %v1761_v45  ;;  %v1764_v60 = vpack.c.bf16 %v1179_v46, %v1179_v46  ;;  %2026 = vpow2.f32 %v1675_v47  ;;  %v1647_v13 = vmul.f32 -1.442695, %v2558_v57 }
 0x105   :  { %v2007_v22 = vpop.eup %2006  ;;  %v1177_v4 = vmul.f32 %v2005_v52, %v2425_v2  ;;  %1529 = vst.msk [vmem:[%s3177_s4 + $0x80] sm:$0xf] %vm1496_vm3, %v1793_v54  ;;  %v1796_v63 = vpack.c.bf16 %v1211_v55, %v1211_v55  ;;  %2028 = vpow2.f32 %v1641_v53  ;;  %v1679_v53 = vmul.f32 -1.442695, %v2570_v62  ;;  %v2597_v21 = vpop.f32.mrb[20].mxu0 }
 0x106   :  { %v2009_v8 = vpop.eup %2008  ;;  %v1209_v39 = vmul.f32 %v2007_v22, %v2428_v3  ;;  %1500 = vst.msk [vmem:[%s3177_s4 + $0xc] sm:$0xf] %vm1496_vm3, %v1764_v60  ;;  %2030 = vpow2.f32 %v1673_v61  ;;  %v2599_v50 = vpop.f32.mrb[20].mxu1 }
 0x107   :  { %v2011_v12 = vpop.eup %2010  ;;  %v1762_v2 = vpack.c.bf16 %v1177_v4, %v1177_v4  ;;  %v1182_v47 = vmul.f32 %v2009_v8, %v2439_v18  ;;  %1532 = vst.msk [vmem:[%s3177_s4 + $0x8c] sm:$0xf] %vm1496_vm3, %v1796_v63  ;;  %2032 = vpow2.f32 %v1644_v7  ;;  %v2608_v7 = vpop.f32.mrb[21].mxu0  ;;  %v672_v4 = vmul.f32 %v2503_v34, %v2387_v38 }
 0x108   :  { %v2013_v20 = vpop.eup %2012  ;;  %v1794_v3 = vpack.c.bf16 %v1209_v39, %v1209_v39  ;;  %v1214_v26 = vmul.f32 %v2011_v12, %v2442_v19  ;;  %2034 = vpow2.f32 %v1676_v59  ;;  %v701_v19 = vmul.f32 %v2387_v38, %v2497_v27  ;;  %v2610_v32 = vpop.f32.mrb[21].mxu1 }
 0x109   :  { %v2015_v18 = vpop.eup %2014  ;;  %1498 = vst.msk [vmem:[%s3177_s4 + $0x4] sm:$0xf] %vm1496_vm3, %v1762_v2  ;;  %v1767_v61 = vpack.c.bf16 %v1182_v47, %v1182_v47  ;;  %v1180_v30 = vmul.f32 %v2013_v20, %v2446_v23  ;;  %2036 = vpow2.f32 %v1642_v36  ;;  %v2618_v23 = vadd.f32 %v2392_v40, %v669_v9  ;;  %v2620_v59 = vpop.f32.mrb[22].mxu0 }
 0x10a   :  { %v2017_v17 = vpop.eup %2016  ;;  %1530 = vst.msk [vmem:[%s3177_s4 + $0x84] sm:$0xf] %vm1496_vm3, %v1794_v3  ;;  %v1799_v58 = vpack.c.bf16 %v1214_v26, %v1214_v26  ;;  %v1212_v45 = vmul.f32 %v2015_v18, %v2449_v24  ;;  %v2622_v27 = vpop.f32.mrb[22].mxu1  ;;  %2038 = vpow2.f32 %v1674_v5  ;;  %v2644_v63 = vadd.f32 %v2392_v40, %v701_v19 }
 0x10b   :  { %v2019_v46 = vpop.eup %2018  ;;  %1503 = vst.msk [vmem:[%s3177_s4 + $0x18] sm:$0xf] %vm1496_vm3, %v1767_v61  ;;  %v1765_v52 = vpack.c.bf16 %v1180_v30, %v1180_v30  ;;  %v1183_v54 = vmul.f32 %v2017_v17, %v2455_v28  ;;  %v2629_v55 = vpop.f32.mrb[23].mxu0  ;;  %2040 = vpow2.f32 %v1647_v13  ;;  %v2651_v9 = vmul.f32 -1.442695, %v2618_v23 }
 0x10c   :  { %v2631_v24 = vpop.f32.mrb[23].mxu1  ;;  %v2021_v36 = vpop.eup %2020  ;;  %1535 = vst.msk [vmem:[%s3177_s4 + $0x98] sm:$0xf] %vm1496_vm3, %v1799_v58  ;;  %v1797_v22 = vpack.c.bf16 %v1212_v45, %v1212_v45  ;;  %v1023_v60 = vadd.f32 1.0, %v2019_v46  ;;  %2042 = vpow2.f32 %v1679_v53  ;;  %v704_v12 = vmul.f32 %v2505_v35, %v2387_v38 }
 0x10d   :  { %v2023_v8 = vpop.eup %2022  ;;  %1501 = vst.msk [vmem:[%s3177_s4 + $0x10] sm:$0xf] %vm1496_vm3, %v1765_v52  ;;  %v1768_v28 = vpack.c.bf16 %v1183_v54, %v1183_v54  ;;  %v989_v5 = vadd.f32 1.0, %v2021_v36  ;;  %v670_v13 = vmul.f32 %v2387_v38, %v2511_v42  ;;  %v702_v20 = vmul.f32 %v2387_v38, %v2513_v43  ;;  %v2668_v18 = vpop.f32.mrb[24].mxu0 }
 0x10e   :  { %v2025_v39 = vpop.eup %2024  ;;  %1533 = vst.msk [vmem:[%s3177_s4 + $0x90] sm:$0xf] %vm1496_vm3, %v1797_v22  ;;  %2044 = vrcp.f32 %v1023_v60  ;;  %v1021_v34 = vadd.f32 1.0, %v2023_v8  ;;  %v2664_v53 = vadd.f32 %v2392_v40, %v672_v4  ;;  %v675_v35 = vmul.f32 %v2531_v14, %v2387_v38  ;;  %v2670_v61 = vpop.f32.mrb[24].mxu1 }
 0x10f   :  { %v2027_v2 = vpop.eup %2026  ;;  %1504 = vst.msk [vmem:[%s3177_s4 + $0x1c] sm:$0xf] %vm1496_vm3, %v1768_v28  ;;  %2046 = vrcp.f32 %v989_v5  ;;  %v994_v47 = vadd.f32 1.0, %v2025_v39  ;;  %v2673_v42 = vmul.f32 -1.442695, %v2644_v63  ;;  %v707_v43 = vmul.f32 %v2533_v15, %v2387_v38  ;;  %v2677_v17 = vpop.f32.mrb[25].mxu0 }
 0x110   :  { %v2029_v3 = vpop.eup %2028  ;;  %2048 = vrcp.f32 %v1021_v34  ;;  %v1026_v26 = vadd.f32 1.0, %v2027_v2  ;;  %v2679_v58 = vpop.f32.mrb[25].mxu1  ;;  %v2682_v46 = vadd.f32 %v2392_v40, %v704_v12  ;;  %v673_v52 = vmul.f32 %v2387_v38, %v2540_v29 }
 0x111   :  { %v2031_v30 = vpop.eup %2030  ;;  %2050 = vrcp.f32 %v994_v47  ;;  %v992_v19 = vadd.f32 1.0, %v2029_v3  ;;  %v2686_v54 = vpop.f32.mrb[26].mxu0  ;;  %v2691_v60 = vadd.f32 %v2392_v40, %v670_v13  ;;  %v2694_v4 = vadd.f32 %v2392_v40, %v702_v20 }
 0x112   :  { %v2033_v45 = vpop.eup %2032  ;;  %2052 = vrcp.f32 %v1026_v26  ;;  %v1024_v14 = vadd.f32 1.0, %v2031_v30  ;;  %v2688_v36 = vpop.f32.mrb[26].mxu1  ;;  %v1648_v39 = vmul.f32 -1.442695, %v2664_v53  ;;  %v2702_v34 = vadd.f32 %v2392_v40, %v675_v35 }
 0x113   :  { %v2035_v22 = vpop.eup %2034  ;;  %2054 = vrcp.f32 %v992_v19  ;;  %v995_v15 = vadd.f32 1.0, %v2033_v45  ;;  %v2696_v8 = vpop.f32.mrb[27].mxu0  ;;  %v2705_v47 = vadd.f32 %v2392_v40, %v707_v43  ;;  %v705_v13 = vmul.f32 %v2387_v38, %v2542_v51 }
 0x114   :  { %3178 = vst [vmem:[#allocation2_spill] sm:$0xff] %v2696_v8  ;;  %v2698_v28 = vpop.f32.mrb[27].mxu1  ;;  %v2037_v5 = vpop.eup %2036  ;;  %2056 = vrcp.f32 %v1024_v14  ;;  %v1027_v29 = vadd.f32 1.0, %v2035_v22  ;;  %v1680_v26 = vmul.f32 -1.442695, %v2682_v46  ;;  %v2711_v30 = vadd.f32 %v2392_v40, %v673_v52 }
 0x115   :  { %3179 = vst [vmem:[#allocation3_spill] sm:$0xff] %v2698_v28  ;;  %v2039_v12 = vpop.eup %2038  ;;  %2058 = vrcp.f32 %v995_v15  ;;  %v993_v2 = vadd.f32 1.0, %v2037_v5  ;;  %v1646_v45 = vmul.f32 -1.442695, %v2691_v60  ;;  %v1678_v14 = vmul.f32 -1.442695, %v2694_v4 }
 0x116   :  { %v2041_v20 = vpop.eup %2040  ;;  %2060 = vrcp.f32 %v1027_v29  ;;  %v1025_v3 = vadd.f32 1.0, %v2039_v12  ;;  %v1651_v51 = vmul.f32 -1.442695, %v2702_v34  ;;  %v676_v15 = vmul.f32 %v2547_v37, %v2387_v38  ;;  %v2718_v5 = vpop.f32.mrb[28].mxu0 }
 0x117   :  { %v2043_v19 = vpop.eup %2042  ;;  %2062 = vrcp.f32 %v993_v2  ;;  %v998_v35 = vadd.f32 1.0, %v2041_v20  ;;  %3180 = vst [vmem:[#allocation4_spill] sm:$0xff] %v2718_v5  ;;  %v2720_v29 = vpop.f32.mrb[28].mxu1  ;;  %v1683_v2 = vmul.f32 -1.442695, %v2705_v47  ;;  %v2725_v20 = vadd.f32 %v2392_v40, %v705_v13 }
 0x118   :  { %v2045_v43 = vpop.eup %2044  ;;  %2064 = vrcp.f32 %v1025_v3  ;;  %v1030_v22 = vadd.f32 1.0, %v2043_v19  ;;  %3181 = vst [vmem:[#allocation5_spill] sm:$0xff] %v2720_v29  ;;  %v2727_v3 = vpop.f32.mrb[29].mxu0  ;;  %v1649_v5 = vmul.f32 -1.442695, %v2711_v30  ;;  %v708_v29 = vmul.f32 %v2549_v56, %v2387_v38 }
 0x119   :  { %v2047_v52 = vpop.eup %2046  ;;  %v1215_v12 = vmul.f32 %v2045_v43, %v2462_v33  ;;  %2066 = vrcp.f32 %v998_v35  ;;  %3182 = vst [vmem:[#allocation6_spill] sm:$0xff] %v2727_v3  ;;  %v2729_v19 = vpop.f32.mrb[29].mxu1 }
 0x11a   :  { %3183 = vst [vmem:[#allocation7_spill] sm:$0xff] %v2729_v19  ;;  %v2049_v28 = vpop.eup %2048  ;;  %v1181_v37 = vmul.f32 %v2047_v52, %v2466_v44  ;;  %2068 = vrcp.f32 %v1030_v22  ;;  %v2735_v33 = vpop.f32.mrb[30].mxu0  ;;  %v674_v19 = vmul.f32 %v2387_v38, %v2560_v6 }
 0x11b   :  { %v2737_v35 = vpop.f32.mrb[30].mxu1  ;;  %v2051_v43 = vpop.eup %2050  ;;  %v1800_v13 = vpack.c.bf16 %v1215_v12, %v1215_v12  ;;  %v1213_v8 = vmul.f32 %v2049_v28, %v2474_v0  ;;  %2070 = vpow2.f32 %v2651_v9  ;;  %v1681_v9 = vmul.f32 -1.442695, %v2725_v20 }
 0x11c   :  { %3184 = vst [vmem:[#allocation8_spill] sm:$0xff] %v2737_v35  ;;  %v2743_v44 = vpop.f32.mrb[31].mxu0  ;;  %v2745_v22 = vpop.f32.mrb[31].mxu1  ;;  %v1766_v3 = vpack.c.bf16 %v1181_v37, %v1181_v37  ;;  %v1186_v56 = vmul.f32 %v2051_v43, %v2482_v10  ;;  %2072 = vpow2.f32 %v2673_v42  ;;  %v2750_v35 = vadd.f32 %v2392_v40, %v676_v15 }
 0x11d   :  { %v2053_v52 = vpop.eup %2052  ;;  %1536 = vst.msk [vmem:[%s3177_s4 + $0x9c] sm:$0xf] %vm1496_vm3, %v1800_v13  ;;  %v1798_v0 = vpack.c.bf16 %v1213_v8, %v1213_v8  ;;  %2074 = vpow2.f32 %v1648_v39  ;;  %v2764_v15 = vadd.f32 %v2392_v40, %v708_v29  ;;  %v2772_v39 = vadd.f32 %v2392_v40, %v674_v19 }
 0x11e   :  { %v2055_v12 = vpop.eup %2054  ;;  %v1218_v6 = vmul.f32 %v2053_v52, %v2485_v11  ;;  %1502 = vst.msk [vmem:[%s3177_s4 + $0x14] sm:$0xf] %vm1496_vm3, %v1766_v3  ;;  %v1771_v10 = vpack.c.bf16 %v1186_v56, %v1186_v56  ;;  %2076 = vpow2.f32 %v1680_v26  ;;  %v1652_v29 = vmul.f32 -1.442695, %v2750_v35 }
 0x11f   :  { %v2057_v28 = vpop.eup %2056  ;;  %v1184_v42 = vmul.f32 %v2055_v12, %v2493_v25  ;;  %1534 = vst.msk [vmem:[%s3177_s4 + $0x94] sm:$0xf] %vm1496_vm3, %v1798_v0  ;;  %2078 = vpow2.f32 %v1646_v45  ;;  %v706_v19 = vmul.f32 %v2387_v38, %v2562_v49  ;;  %v1684_v52 = vmul.f32 -1.442695, %v2764_v15 }
 0x120   :  { %v2059_v37 = vpop.eup %2058  ;;  %v1803_v11 = vpack.c.bf16 %v1218_v6, %v1218_v6  ;;  %v1216_v8 = vmul.f32 %v2057_v28, %v2500_v31  ;;  %1507 = vst.msk [vmem:[%s3177_s4 + $0x28] sm:$0xf] %vm1496_vm3, %v1771_v10  ;;  %2080 = vpow2.f32 %v1678_v14  ;;  %v679_v0 = vmul.f32 %v2597_v21, %v2387_v38 }
 0x121   :  { %v2061_v3 = vpop.eup %2060  ;;  %v1769_v25 = vpack.c.bf16 %v1184_v42, %v1184_v42  ;;  %v1187_v26 = vmul.f32 %v2059_v37, %v2509_v41  ;;  %2082 = vpow2.f32 %v1651_v51  ;;  %v1650_v51 = vmul.f32 -1.442695, %v2772_v39 }
 0x122   :  { %v2063_v43 = vpop.eup %2062  ;;  %1539 = vst.msk [vmem:[%s3177_s4 + $0xa8] sm:$0xf] %vm1496_vm3, %v1803_v11  ;;  %v1801_v31 = vpack.c.bf16 %v1216_v8, %v1216_v8  ;;  %v1219_v45 = vmul.f32 %v2061_v3, %v2517_v48  ;;  %2084 = vpow2.f32 %v1683_v2  ;;  %v2816_v21 = vadd.f32 %v2392_v40, %v706_v19 }
 0x123   :  { %v2065_v13 = vpop.eup %2064  ;;  %1505 = vst.msk [vmem:[%s3177_s4 + $0x20] sm:$0xf] %vm1496_vm3, %v1769_v25  ;;  %v1772_v41 = vpack.c.bf16 %v1187_v26, %v1187_v26  ;;  %v1185_v14 = vmul.f32 %v2063_v43, %v2523_v1  ;;  %2086 = vpow2.f32 %v1649_v5  ;;  %v711_v37 = vmul.f32 %v2599_v50, %v2387_v38 }
 0x124   :  { %v2067_v56 = vpop.eup %2066  ;;  %1537 = vst.msk [vmem:[%s3177_s4 + $0xa0] sm:$0xf] %vm1496_vm3, %v1801_v31  ;;  %v1804_v48 = vpack.c.bf16 %v1219_v45, %v1219_v45  ;;  %v1217_v49 = vmul.f32 %v2065_v13, %v2538_v16  ;;  %2088 = vpow2.f32 %v1681_v9  ;;  %v2829_v3 = vadd.f32 %v2392_v40, %v679_v0 }
 0x125   :  { %v2069_v12 = vpop.eup %2068  ;;  %1508 = vst.msk [vmem:[%s3177_s4 + $0x2c] sm:$0xf] %vm1496_vm3, %v1772_v41  ;;  %v1770_v1 = vpack.c.bf16 %v1185_v14, %v1185_v14  ;;  %v1190_v2 = vmul.f32 %v2067_v56, %v2558_v57  ;;  %2090 = vpow2.f32 %v1652_v29  ;;  %v677_v25 = vmul.f32 %v2387_v38, %v2608_v7 }
 0x126   :  { %v2071_v6 = vpop.eup %2070  ;;  %1540 = vst.msk [vmem:[%s3177_s4 + $0xac] sm:$0xf] %vm1496_vm3, %v1804_v48  ;;  %v1802_v16 = vpack.c.bf16 %v1217_v49, %v1217_v49  ;;  %v1222_v5 = vmul.f32 %v2069_v12, %v2570_v62  ;;  %2092 = vpow2.f32 %v1684_v52  ;;  %v709_v29 = vmul.f32 %v2387_v38, %v2610_v32 }
 0x127   :  { %v2073_v28 = vpop.eup %2072  ;;  %1506 = vst.msk [vmem:[%s3177_s4 + $0x24] sm:$0xf] %vm1496_vm3, %v1770_v1  ;;  %v1775_v57 = vpack.c.bf16 %v1190_v2, %v1190_v2  ;;  %v996_v9 = vadd.f32 1.0, %v2071_v6  ;;  %2094 = vpow2.f32 %v1650_v51  ;;  %v680_v43 = vmul.f32 %v2620_v59, %v2387_v38 }
 0x128   :  { %v2075_v10 = vpop.eup %2074  ;;  %1538 = vst.msk [vmem:[%s3177_s4 + $0xa4] sm:$0xf] %vm1496_vm3, %v1802_v16  ;;  %v1807_v62 = vpack.c.bf16 %v1222_v5, %v1222_v5  ;;  %v1028_v42 = vadd.f32 1.0, %v2073_v28  ;;  %v1682_v19 = vmul.f32 -1.442695, %v2816_v21  ;;  %v712_v7 = vmul.f32 %v2622_v27, %v2387_v38 }
 0x129   :  { %v2077_v11 = vpop.eup %2076  ;;  %1511 = vst.msk [vmem:[%s3177_s4 + $0x38] sm:$0xf] %vm1496_vm3, %v1775_v57  ;;  %2096 = vrcp.f32 %v996_v9  ;;  %v999_v8 = vadd.f32 1.0, %v2075_v10  ;;  %v2845_v14 = vadd.f32 %v2392_v40, %v711_v37  ;;  %v678_v32 = vmul.f32 %v2387_v38, %v2629_v55 }
 0x12a   :  { %v2079_v26 = vpop.eup %2078  ;;  %1543 = vst.msk [vmem:[%s3177_s4 + $0xb8] sm:$0xf] %vm1496_vm3, %v1807_v62  ;;  %2098 = vrcp.f32 %v1028_v42  ;;  %v1031_v50 = vadd.f32 1.0, %v2077_v11  ;;  %v1655_v56 = vmul.f32 -1.442695, %v2829_v3  ;;  %v2851_v48 = vadd.f32 %v2392_v40, %v677_v25 }
 0x12b   :  { %v2081_v31 = vpop.eup %2080  ;;  %2100 = vrcp.f32 %v999_v8  ;;  %v997_v45 = vadd.f32 1.0, %v2079_v26  ;;  %v2854_v51 = vadd.f32 %v2392_v40, %v709_v29  ;;  %v2857_v12 = vadd.f32 %v2392_v40, %v680_v43 }
 0x12c   :  { %v2083_v13 = vpop.eup %2082  ;;  %2102 = vrcp.f32 %v1031_v50  ;;  %v1029_v41 = vadd.f32 1.0, %v2081_v31  ;;  %v2860_v2 = vadd.f32 %v2392_v40, %v712_v7  ;;  %v710_v0 = vmul.f32 %v2387_v38, %v2631_v24 }
 0x12d   :  { %v2085_v52 = vpop.eup %2084  ;;  %2104 = vrcp.f32 %v997_v45  ;;  %v1002_v59 = vadd.f32 1.0, %v2083_v13  ;;  %v1687_v5 = vmul.f32 -1.442695, %v2845_v14  ;;  %v2866_v28 = vadd.f32 %v2392_v40, %v678_v32 }
 0x12e   :  { %v2087_v49 = vpop.eup %2086  ;;  %2106 = vrcp.f32 %v1029_v41  ;;  %v1034_v27 = vadd.f32 1.0, %v2085_v52  ;;  %v1653_v10 = vmul.f32 -1.442695, %v2851_v48  ;;  %v683_v62 = vmul.f32 %v2668_v18, %v2387_v38 }
 0x12f   :  { %v2089_v1 = vpop.eup %2088  ;;  %2108 = vrcp.f32 %v1002_v59  ;;  %v1000_v55 = vadd.f32 1.0, %v2087_v49  ;;  %v1685_v24 = vmul.f32 -1.442695, %v2854_v51  ;;  %v1656_v11 = vmul.f32 -1.442695, %v2857_v12 }
 0x130   :  { %v2091_v6 = vpop.eup %2090  ;;  %2110 = vrcp.f32 %v1034_v27  ;;  %v1032_v16 = vadd.f32 1.0, %v2089_v1  ;;  %v1688_v26 = vmul.f32 -1.442695, %v2860_v2  ;;  %v2875_v50 = vadd.f32 %v2392_v40, %v710_v0 }
 0x131   :  { %v2093_v57 = vpop.eup %2092  ;;  %2112 = vrcp.f32 %v1000_v55  ;;  %v1003_v9 = vadd.f32 1.0, %v2091_v6  ;;  %v1654_v18 = vmul.f32 -1.442695, %v2866_v28  ;;  %v715_v31 = vmul.f32 %v2670_v61, %v2387_v38 }
 0x132   :  { %v2095_v42 = vpop.eup %2094  ;;  %2114 = vrcp.f32 %v1032_v16  ;;  %v1035_v37 = vadd.f32 1.0, %v2093_v57  ;;  %v2883_v13 = vadd.f32 %v2392_v40, %v683_v62  ;;  %v681_v41 = vmul.f32 %v2387_v38, %v2677_v17 }
 0x133   :  { %v2097_v8 = vpop.eup %2096  ;;  %2116 = vrcp.f32 %v1003_v9  ;;  %v1001_v25 = vadd.f32 1.0, %v2095_v42  ;;  %v713_v59 = vmul.f32 %v2387_v38, %v2679_v58 }
 0x134   :  { %v2099_v29 = vpop.eup %2098  ;;  %v1188_v43 = vmul.f32 %v2097_v8, %v2618_v23  ;;  %2118 = vrcp.f32 %v1035_v37  ;;  %v1659_v57 = vmul.f32 -1.442695, %v2883_v13 }
 0x135   :  { %v2101_v45 = vpop.eup %2100  ;;  %v1220_v7 = vmul.f32 %v2099_v29, %v2644_v63  ;;  %2120 = vrcp.f32 %v1001_v25  ;;  %v1686_v63 = vmul.f32 -1.442695, %v2875_v50  ;;  %v2914_v6 = vadd.f32 %v2392_v40, %v713_v59  ;;  %v2948_v29 = vld [vmem:[%s3175_s2] ss:$0 sm:$0xff] }
 0x136   :  { %v2103_v32 = vpop.eup %2102  ;;  %v1773_v52 = vpack.c.bf16 %v1188_v43, %v1188_v43  ;;  %v1191_v23 = vmul.f32 %v2101_v45, %v2664_v53  ;;  %2122 = vpow2.f32 %v1682_v19  ;;  %v2898_v19 = vadd.f32 %v2392_v40, %v715_v31 }
 0x137   :  { %v2105_v49 = vpop.eup %2104  ;;  %v1805_v61 = vpack.c.bf16 %v1220_v7, %v1220_v7  ;;  %v1223_v27 = vmul.f32 %v2103_v32, %v2682_v46  ;;  %2124 = vpow2.f32 %v1655_v56  ;;  %v2906_v56 = vadd.f32 %v2392_v40, %v681_v41 }
 0x138   :  { %v2107_v1 = vpop.eup %2106  ;;  %1509 = vst.msk [vmem:[%s3177_s4 + $0x30] sm:$0xf] %vm1496_vm3, %v1773_v52  ;;  %v1776_v17 = vpack.c.bf16 %v1191_v23, %v1191_v23  ;;  %v1189_v53 = vmul.f32 %v2105_v49, %v2691_v60  ;;  %2126 = vpow2.f32 %v1687_v5  ;;  %v1689_v8 = vmul.f32 -1.442695, %v2914_v6  ;;  %v3185_v52 = vld [vmem:[#allocation2_spill] sm:$0xff] }
 0x139   :  { %v2109_v38 = vpop.eup %2108  ;;  %1541 = vst.msk [vmem:[%s3177_s4 + $0xb0] sm:$0xf] %vm1496_vm3, %v1805_v61  ;;  %v1808_v58 = vpack.c.bf16 %v1223_v27, %v1223_v27  ;;  %v1221_v46 = vmul.f32 %v2107_v1, %v2694_v4  ;;  %2128 = vpow2.f32 %v1653_v10  ;;  %v1691_v10 = vmul.f32 -1.442695, %v2898_v19  ;;  %v2976_v49 = vld [vmem:[%s3176_s3] ss:$0 sm:$0xff] }
 0x13a   :  { %v2111_v55 = vpop.eup %2110  ;;  %1512 = vst.msk [vmem:[%s3177_s4 + $0x3c] sm:$0xf] %vm1496_vm3, %v1776_v17  ;;  %v1774_v60 = vpack.c.bf16 %v1189_v53, %v1189_v53  ;;  %v1194_v0 = vmul.f32 %v2109_v38, %v2702_v34  ;;  %2130 = vpow2.f32 %v1685_v24  ;;  %v1657_v37 = vmul.f32 -1.442695, %v2906_v56  ;;  %v3186_v27 = vld [vmem:[#allocation3_spill] sm:$0xff]  ;;  %v3187_v53 = vld [vmem:[#allocation4_spill] sm:$0xff] }
 0x13b   :  { %v2113_v16 = vpop.eup %2112  ;;  %1544 = vst.msk [vmem:[%s3177_s4 + $0xbc] sm:$0xf] %vm1496_vm3, %v1808_v58  ;;  %v1806_v4 = vpack.c.bf16 %v1221_v46, %v1221_v46  ;;  %v1226_v5 = vmul.f32 %v2111_v55, %v2705_v47  ;;  %2132 = vpow2.f32 %v1656_v11  ;;  %v682_v23 = vmul.f32 %v2948_v29, %v3185_v52 }
 0x13c   :  { %v2115_v9 = vpop.eup %2114  ;;  %1510 = vst.msk [vmem:[%s3177_s4 + $0x34] sm:$0xf] %vm1496_vm3, %v1774_v60  ;;  %v1779_v40 = vpack.c.bf16 %v1194_v0, %v1194_v0  ;;  %v1192_v34 = vmul.f32 %v2113_v16, %v2711_v30  ;;  %2134 = vpow2.f32 %v1688_v26  ;;  %v687_v38 = vmul.f32 %v2948_v29, %v3187_v53  ;;  %v3188_v60 = vld [vmem:[#allocation5_spill] sm:$0xff] }
 0x13d   :  { %v2117_v62 = vpop.eup %2116  ;;  %1542 = vst.msk [vmem:[%s3177_s4 + $0xb4] sm:$0xf] %vm1496_vm3, %v1806_v4  ;;  %v1811_v47 = vpack.c.bf16 %v1226_v5, %v1226_v5  ;;  %v1224_v42 = vmul.f32 %v2115_v9, %v2725_v20  ;;  %2136 = vpow2.f32 %v1654_v18  ;;  %v719_v0 = vmul.f32 %v2948_v29, %v3188_v60 }
 0x13e   :  { %v2119_v24 = vpop.eup %2118  ;;  %1515 = vst.msk [vmem:[%s3177_s4 + $0x48] sm:$0xf] %vm1496_vm3, %v1779_v40  ;;  %v1777_v30 = vpack.c.bf16 %v1192_v34, %v1192_v34  ;;  %v1195_v11 = vmul.f32 %v2117_v62, %v2750_v35  ;;  %2138 = vpow2.f32 %v1686_v63  ;;  %v684_v35 = vmul.f32 %v2948_v29, %v2686_v54 }
 0x13f   :  { %v2121_v25 = vpop.eup %2120  ;;  %1547 = vst.msk [vmem:[%s3177_s4 + $0xc8] sm:$0xf] %vm1496_vm3, %v1811_v47  ;;  %v1809_v20 = vpack.c.bf16 %v1224_v42, %v1224_v42  ;;  %v1227_v26 = vmul.f32 %v2119_v24, %v2764_v15  ;;  %2140 = vpow2.f32 %v1659_v57  ;;  %v716_v54 = vmul.f32 %v2948_v29, %v2688_v36  ;;  %v3189_v57 = vld [vmem:[#allocation6_spill] sm:$0xff]  ;;  %v3190_v24 = vld [vmem:[#allocation7_spill] sm:$0xff] }
 0x140   :  { %v2123_v43 = vpop.eup %2122  ;;  %1513 = vst.msk [vmem:[%s3177_s4 + $0x40] sm:$0xf] %vm1496_vm3, %v1777_v30  ;;  %v1780_v18 = vpack.c.bf16 %v1195_v11, %v1195_v11  ;;  %v1193_v31 = vmul.f32 %v2121_v25, %v2772_v39  ;;  %2142 = vpow2.f32 %v1691_v10  ;;  %v2979_v61 = vadd.f32 %v2976_v49, %v684_v35 }
 0x141   :  { %v2125_v15 = vpop.eup %2124  ;;  %1545 = vst.msk [vmem:[%s3177_s4 + $0xc0] sm:$0xf] %vm1496_vm3, %v1809_v20  ;;  %v1812_v45 = vpack.c.bf16 %v1227_v26, %v1227_v26  ;;  %v1033_v7 = vadd.f32 1.0, %v2123_v43  ;;  %2144 = vpow2.f32 %v1657_v37  ;;  %v714_v63 = vmul.f32 %v2948_v29, %v3186_v27 }
 0x142   :  { %v2127_v41 = vpop.eup %2126  ;;  %1516 = vst.msk [vmem:[%s3177_s4 + $0x4c] sm:$0xf] %vm1496_vm3, %v1780_v18  ;;  %v1778_v39 = vpack.c.bf16 %v1193_v31, %v1193_v31  ;;  %v1006_v32 = vadd.f32 1.0, %v2125_v15  ;;  %2146 = vpow2.f32 %v1689_v8  ;;  %v2990_v55 = vadd.f32 %v2976_v49, %v716_v54 }
 0x143   :  { %v2129_v59 = vpop.eup %2128  ;;  %1548 = vst.msk [vmem:[%s3177_s4 + $0xcc] sm:$0xf] %vm1496_vm3, %v1812_v45  ;;  %2148 = vrcp.f32 %v1033_v7  ;;  %v1038_v36 = vadd.f32 1.0, %v2127_v41  ;;  %v2995_v5 = vadd.f32 %v2976_v49, %v682_v23  ;;  %v685_v9 = vmul.f32 %v2948_v29, %v3189_v57 }
 0x144   :  { %v2131_v1 = vpop.eup %2130  ;;  %1514 = vst.msk [vmem:[%s3177_s4 + $0x44] sm:$0xf] %vm1496_vm3, %v1778_v39  ;;  %2150 = vrcp.f32 %v1006_v32  ;;  %v1004_v17 = vadd.f32 1.0, %v2129_v59  ;;  %v1660_v10 = vmul.f32 -1.442695, %v2979_v61  ;;  %v3001_v62 = vadd.f32 %v2976_v49, %v714_v63 }
 0x145   :  { %v2133_v58 = vpop.eup %2132  ;;  %2152 = vrcp.f32 %v1038_v36  ;;  %v1036_v46 = vadd.f32 1.0, %v2131_v1  ;;  %v3004_v37 = vadd.f32 %v2976_v49, %v687_v38  ;;  %v717_v30 = vmul.f32 %v2948_v29, %v3190_v24  ;;  %v3191_v36 = vld [vmem:[#allocation8_spill] sm:$0xff] }
 0x146   :  { %v2135_v16 = vpop.eup %2134  ;;  %2154 = vrcp.f32 %v1004_v17  ;;  %v1007_v4 = vadd.f32 1.0, %v2133_v58  ;;  %v1692_v25 = vmul.f32 -1.442695, %v2990_v55  ;;  %v3010_v20 = vadd.f32 %v2976_v49, %v719_v0 }
 0x147   :  { %v2137_v40 = vpop.eup %2136  ;;  %2156 = vrcp.f32 %v1036_v46  ;;  %v1039_v34 = vadd.f32 1.0, %v2135_v16  ;;  %v1658_v43 = vmul.f32 -1.442695, %v2995_v5  ;;  %v3014_v18 = vadd.f32 %v2976_v49, %v685_v9 }
 0x148   :  { %v2139_v47 = vpop.eup %2138  ;;  %2158 = vrcp.f32 %v1007_v4  ;;  %v1005_v42 = vadd.f32 1.0, %v2137_v40  ;;  %v1690_v45 = vmul.f32 -1.442695, %v3001_v62  ;;  %v688_v7 = vmul.f32 %v2948_v29, %v2735_v33 }
 0x149   :  { %v2141_v11 = vpop.eup %2140  ;;  %2160 = vrcp.f32 %v1039_v34  ;;  %v1037_v8 = vadd.f32 1.0, %v2139_v47  ;;  %v1663_v39 = vmul.f32 -1.442695, %v3004_v37  ;;  %v3021_v32 = vadd.f32 %v2976_v49, %v717_v30 }
 0x14a   :  { %v2143_v26 = vpop.eup %2142  ;;  %2162 = vrcp.f32 %v1005_v42  ;;  %v1010_v35 = vadd.f32 1.0, %v2141_v11  ;;  %v1695_v59 = vmul.f32 -1.442695, %v3010_v20  ;;  %v720_v27 = vmul.f32 %v2948_v29, %v3191_v36 }
 0x14b   :  { %v2145_v31 = vpop.eup %2144  ;;  %2164 = vrcp.f32 %v1037_v8  ;;  %v1042_v15 = vadd.f32 1.0, %v2143_v26  ;;  %v1661_v33 = vmul.f32 -1.442695, %v3014_v18  ;;  %v686_v17 = vmul.f32 %v2948_v29, %v2743_v44 }
 0x14c   :  { %v2147_v54 = vpop.eup %2146  ;;  %2166 = vrcp.f32 %v1010_v35  ;;  %v1008_v41 = vadd.f32 1.0, %v2145_v31  ;;  %v3032_v58 = vadd.f32 %v2976_v49, %v688_v7  ;;  %v718_v46 = vmul.f32 %v2948_v29, %v2745_v22 }
 0x14d   :  { %v2149_v52 = vpop.eup %2148  ;;  %2168 = vrcp.f32 %v1042_v15  ;;  %v1040_v23 = vadd.f32 1.0, %v2147_v54  ;;  %v1693_v16 = vmul.f32 -1.442695, %v3021_v32  ;;  %v3048_v29 = vadd.f32 %v2976_v49, %v686_v17 }
 0x14e   :  { %v2151_v63 = vpop.eup %2150  ;;  %v1225_v1 = vmul.f32 %v2149_v52, %v2816_v21  ;;  %2170 = vrcp.f32 %v1008_v41  ;;  %v1664_v24 = vmul.f32 -1.442695, %v3032_v58 }
 0x14f   :  { %v2153_v53 = vpop.eup %2152  ;;  %v1198_v38 = vmul.f32 %v2151_v63, %v2829_v3  ;;  %2172 = vrcp.f32 %v1040_v23  ;;  %v3040_v3 = vadd.f32 %v2976_v49, %v720_v27  ;;  %v1662_v26 = vmul.f32 -1.442695, %v3048_v29 }
 0x150   :  { %v2155_v60 = vpop.eup %2154  ;;  %v1810_v0 = vpack.c.bf16 %v1225_v1, %v1225_v1  ;;  %v1230_v21 = vmul.f32 %v2153_v53, %v2845_v14  ;;  %2174 = vpow2.f32 %v1660_v10  ;;  %v3056_v10 = vadd.f32 %v2976_v49, %v718_v46 }
 0x151   :  { %v2157_v4 = vpop.eup %2156  ;;  %v1783_v57 = vpack.c.bf16 %v1198_v38, %v1198_v38  ;;  %v1196_v44 = vmul.f32 %v2155_v60, %v2851_v48  ;;  %2176 = vpow2.f32 %v1692_v25  ;;  %v1696_v11 = vmul.f32 -1.442695, %v3040_v3 }
 0x152   :  { %v2159_v9 = vpop.eup %2158  ;;  %1546 = vst.msk [vmem:[%s3177_s4 + $0xc4] sm:$0xf] %vm1496_vm3, %v1810_v0  ;;  %v1815_v22 = vpack.c.bf16 %v1230_v21, %v1230_v21  ;;  %v1228_v14 = vmul.f32 %v2157_v4, %v2854_v51  ;;  %2178 = vpow2.f32 %v1658_v43  ;;  %v1694_v31 = vmul.f32 -1.442695, %v3056_v10 }
 0x153   :  { %v2161_v40 = vpop.eup %2160  ;;  %1519 = vst.msk [vmem:[%s3177_s4 + $0x58] sm:$0xf] %vm1496_vm3, %v1783_v57  ;;  %v1781_v48 = vpack.c.bf16 %v1196_v44, %v1196_v44  ;;  %v1199_v34 = vmul.f32 %v2159_v9, %v2857_v12  ;;  %2180 = vpow2.f32 %v1690_v45 }
 0x154   :  { %v2163_v47 = vpop.eup %2162  ;;  %1551 = vst.msk [vmem:[%s3177_s4 + $0xd8] sm:$0xf] %vm1496_vm3, %v1815_v22  ;;  %v1813_v51 = vpack.c.bf16 %v1228_v14, %v1228_v14  ;;  %v1231_v42 = vmul.f32 %v2161_v40, %v2860_v2  ;;  %2182 = vpow2.f32 %v1663_v39 }
 0x155   :  { %v2165_v30 = vpop.eup %2164  ;;  %1517 = vst.msk [vmem:[%s3177_s4 + $0x50] sm:$0xf] %vm1496_vm3, %v1781_v48  ;;  %v1784_v12 = vpack.c.bf16 %v1199_v34, %v1199_v34  ;;  %v1197_v49 = vmul.f32 %v2163_v47, %v2866_v28  ;;  %2184 = vpow2.f32 %v1695_v59 }
 0x156   :  { %v2167_v8 = vpop.eup %2166  ;;  %1549 = vst.msk [vmem:[%s3177_s4 + $0xd0] sm:$0xf] %vm1496_vm3, %v1813_v51  ;;  %v1816_v2 = vpack.c.bf16 %v1231_v42, %v1231_v42  ;;  %v1229_v25 = vmul.f32 %v2165_v30, %v2875_v50  ;;  %2186 = vpow2.f32 %v1661_v33 }
 0x157   :  { %v2169_v35 = vpop.eup %2168  ;;  %1520 = vst.msk [vmem:[%s3177_s4 + $0x5c] sm:$0xf] %vm1496_vm3, %v1784_v12  ;;  %v1782_v28 = vpack.c.bf16 %v1197_v49, %v1197_v49  ;;  %v1202_v43 = vmul.f32 %v2167_v8, %v2883_v13  ;;  %2188 = vpow2.f32 %v1693_v16 }
 0x158   :  { %v2171_v15 = vpop.eup %2170  ;;  %1552 = vst.msk [vmem:[%s3177_s4 + $0xdc] sm:$0xf] %vm1496_vm3, %v1816_v2  ;;  %v1814_v50 = vpack.c.bf16 %v1229_v25, %v1229_v25  ;;  %v1234_v45 = vmul.f32 %v2169_v35, %v2898_v19  ;;  %2190 = vpow2.f32 %v1664_v24 }
 0x159   :  { %v2173_v7 = vpop.eup %2172  ;;  %1518 = vst.msk [vmem:[%s3177_s4 + $0x54] sm:$0xf] %vm1496_vm3, %v1782_v28  ;;  %v1787_v13 = vpack.c.bf16 %v1202_v43, %v1202_v43  ;;  %v1200_v54 = vmul.f32 %v2171_v15, %v2906_v56  ;;  %2192 = vpow2.f32 %v1696_v11 }
 0x15a   :  { %v2175_v41 = vpop.eup %2174  ;;  %1550 = vst.msk [vmem:[%s3177_s4 + $0xd4] sm:$0xf] %vm1496_vm3, %v1814_v50  ;;  %v1819_v39 = vpack.c.bf16 %v1234_v45, %v1234_v45  ;;  %v1232_v19 = vmul.f32 %v2173_v7, %v2914_v6  ;;  %2194 = vpow2.f32 %v1662_v26 }
 0x15b   :  { %v2177_v52 = vpop.eup %2176  ;;  %1523 = vst.msk [vmem:[%s3177_s4 + $0x68] sm:$0xf] %vm1496_vm3, %v1787_v13  ;;  %v1785_v23 = vpack.c.bf16 %v1200_v54, %v1200_v54  ;;  %v1011_v59 = vadd.f32 1.0, %v2175_v41  ;;  %2196 = vpow2.f32 %v1694_v31 }
 0x15c   :  { %v2179_v56 = vpop.eup %2178  ;;  %1555 = vst.msk [vmem:[%s3177_s4 + $0xe8] sm:$0xf] %vm1496_vm3, %v1819_v39  ;;  %v1817_v36 = vpack.c.bf16 %v1232_v19, %v1232_v19  ;;  %v1043_v27 = vadd.f32 1.0, %v2177_v52 }
 0x15d   :  { %v2181_v63 = vpop.eup %2180  ;;  %1521 = vst.msk [vmem:[%s3177_s4 + $0x60] sm:$0xf] %vm1496_vm3, %v1785_v23  ;;  %2198 = vrcp.f32 %v1011_v59  ;;  %v1009_v6 = vadd.f32 1.0, %v2179_v56 }
 0x15e   :  { %v2183_v1 = vpop.eup %2182  ;;  %1553 = vst.msk [vmem:[%s3177_s4 + $0xe0] sm:$0xf] %vm1496_vm3, %v1817_v36  ;;  %2200 = vrcp.f32 %v1043_v27  ;;  %v1041_v33 = vadd.f32 1.0, %v2181_v63 }
 0x15f   :  { %v2185_v17 = vpop.eup %2184  ;;  %2202 = vrcp.f32 %v1009_v6  ;;  %v1014_v53 = vadd.f32 1.0, %v2183_v1 }
 0x160   :  { %v2187_v38 = vpop.eup %2186  ;;  %2204 = vrcp.f32 %v1041_v33  ;;  %v1046_v46 = vadd.f32 1.0, %v2185_v17 }
 0x161   :  { %v2189_v60 = vpop.eup %2188  ;;  %2206 = vrcp.f32 %v1014_v53  ;;  %v1012_v0 = vadd.f32 1.0, %v2187_v38 }
 0x162   :  { %v2191_v21 = vpop.eup %2190  ;;  %2208 = vrcp.f32 %v1046_v46  ;;  %v1044_v16 = vadd.f32 1.0, %v2189_v60 }
 0x163   :  { %v2193_v4 = vpop.eup %2192  ;;  %2210 = vrcp.f32 %v1012_v0  ;;  %v1015_v57 = vadd.f32 1.0, %v2191_v21 }
 0x164   :  { %v2195_v44 = vpop.eup %2194  ;;  %2212 = vrcp.f32 %v1044_v16  ;;  %v1047_v9 = vadd.f32 1.0, %v2193_v4 }
 0x165   :  { %v2197_v22 = vpop.eup %2196  ;;  %2214 = vrcp.f32 %v1015_v57  ;;  %v1013_v14 = vadd.f32 1.0, %v2195_v44 }
 0x166   :  { %2216 = vrcp.f32 %v1047_v9  ;;  %v1045_v40 = vadd.f32 1.0, %v2197_v22 }
 0x167   :  { %v2199_v48 = vpop.eup %2198  ;;  %2218 = vrcp.f32 %v1013_v14 }
 0x168   :  { %v2201_v34 = vpop.eup %2200  ;;  %v1203_v47 = vmul.f32 %v2199_v48, %v2979_v61  ;;  %2220 = vrcp.f32 %v1045_v40 }
 0x169   :  { %v2203_v51 = vpop.eup %2202  ;;  %v1235_v42 = vmul.f32 %v2201_v34, %v2990_v55 }
 0x16a   :  { %v2205_v24 = vpop.eup %2204  ;;  %v1788_v30 = vpack.c.bf16 %v1203_v47, %v1203_v47  ;;  %v1201_v12 = vmul.f32 %v2203_v51, %v2995_v5 }
 0x16b   :  { %v2207_v49 = vpop.eup %2206  ;;  %v1820_v11 = vpack.c.bf16 %v1235_v42, %v1235_v42  ;;  %v1233_v8 = vmul.f32 %v2205_v24, %v3001_v62 }
 0x16c   :  { %v2209_v2 = vpop.eup %2208  ;;  %1524 = vst.msk [vmem:[%s3177_s4 + $0x6c] sm:$0xf] %vm1496_vm3, %v1788_v30  ;;  %v1786_v25 = vpack.c.bf16 %v1201_v12, %v1201_v12  ;;  %v1206_v61 = vmul.f32 %v2207_v49, %v3004_v37 }
 0x16d   :  { %v2211_v26 = vpop.eup %2210  ;;  %1556 = vst.msk [vmem:[%s3177_s4 + $0xec] sm:$0xf] %vm1496_vm3, %v1820_v11  ;;  %v1818_v55 = vpack.c.bf16 %v1233_v8, %v1233_v8  ;;  %v1238_v5 = vmul.f32 %v2209_v2, %v3010_v20 }
 0x16e   :  { %v2213_v35 = vpop.eup %2212  ;;  %1522 = vst.msk [vmem:[%s3177_s4 + $0x64] sm:$0xf] %vm1496_vm3, %v1786_v25  ;;  %v1791_v62 = vpack.c.bf16 %v1206_v61, %v1206_v61  ;;  %v1204_v28 = vmul.f32 %v2211_v26, %v3014_v18 }
 0x16f   :  { %v2215_v43 = vpop.eup %2214  ;;  %1554 = vst.msk [vmem:[%s3177_s4 + $0xe4] sm:$0xf] %vm1496_vm3, %v1818_v55  ;;  %v1823_v37 = vpack.c.bf16 %v1238_v5, %v1238_v5  ;;  %v1236_v31 = vmul.f32 %v2213_v35, %v3021_v32 }
 0x170   :  { %v2217_v15 = vpop.eup %2216  ;;  %1527 = vst.msk [vmem:[%s3177_s4 + $0x78] sm:$0xf] %vm1496_vm3, %v1791_v62  ;;  %v1789_v20 = vpack.c.bf16 %v1204_v28, %v1204_v28  ;;  %v1207_v50 = vmul.f32 %v2215_v43, %v3032_v58 }
 0x171   :  { %v2219_v45 = vpop.eup %2218  ;;  %1559 = vst.msk [vmem:[%s3177_s4 + $0xf8] sm:$0xf] %vm1496_vm3, %v1823_v37  ;;  %v1821_v18 = vpack.c.bf16 %v1236_v31, %v1236_v31  ;;  %v1239_v7 = vmul.f32 %v2217_v15, %v3040_v3 }
 0x172   :  { %v2221_v13 = vpop.eup %2220  ;;  %1525 = vst.msk [vmem:[%s3177_s4 + $0x70] sm:$0xf] %vm1496_vm3, %v1789_v20  ;;  %v1792_v32 = vpack.c.bf16 %v1207_v50, %v1207_v50  ;;  %v1205_v54 = vmul.f32 %v2219_v45, %v3048_v29 }
 0x173   :  { %1557 = vst.msk [vmem:[%s3177_s4 + $0xf0] sm:$0xf] %vm1496_vm3, %v1821_v18  ;;  %v1824_v58 = vpack.c.bf16 %v1239_v7, %v1239_v7  ;;  %v1237_v41 = vmul.f32 %v2221_v13, %v3056_v10 }
 0x174   :  { %1528 = vst.msk [vmem:[%s3177_s4 + $0x7c] sm:$0xf] %vm1496_vm3, %v1792_v32  ;;  %v1790_v3 = vpack.c.bf16 %v1205_v54, %v1205_v54 }
 0x175   :  { %1560 = vst.msk [vmem:[%s3177_s4 + $0xfc] sm:$0xf] %vm1496_vm3, %v1824_v58  ;;  %v1822_v29 = vpack.c.bf16 %v1237_v41, %v1237_v41 }
 0x176   :  { %1526 = vst.msk [vmem:[%s3177_s4 + $0x74] sm:$0xf] %vm1496_vm3, %v1790_v3 }
 0x177   :  { %1558 = vst.msk [vmem:[%s3177_s4 + $0xf4] sm:$0xf] %vm1496_vm3, %v1822_v29 }

</bundles_post_ra>
